<compile_context>
chip_gen: v7x
topology: tpu7x:2x2x1
jax: 0.10.0
libtpu: 0.0.40
codegen_flags: <defaults>
</compile_context>

<pallas_src>
import math
import jax
import jax.numpy as jnp
from jax.experimental import pallas as pl
from jax.experimental.pallas import tpu as pltpu


def critic_kernel(x_ref,
                  w1_ref, b1_ref,
                  w2_ref, b2_ref,
                  w3_ref, b3_ref,
                  w4_ref, b4_ref,
                  w5_ref, b5_ref,
                  out_ref):
    """Fused forward pass for one batch tile, feature-major (features x TB)."""
    h = x_ref[...]                                   # (state_dim, TB) bf16

    # net: Linear(state_dim, 64) -> ReLU
    a = jnp.dot(w1_ref[...], h, preferred_element_type=jnp.float32) + b1_ref[...]
    h = jnp.maximum(a, 0.0).astype(jnp.bfloat16)     # (64, TB)

    # net: Linear(64, 128) -> ReLU
    a = jnp.dot(w2_ref[...], h, preferred_element_type=jnp.float32) + b2_ref[...]
    h = jnp.maximum(a, 0.0).astype(jnp.bfloat16)     # (128, TB)

    # net: Linear(128, 64) -> ReLU
    a = jnp.dot(w3_ref[...], h, preferred_element_type=jnp.float32) + b3_ref[...]
    h = jnp.maximum(a, 0.0).astype(jnp.bfloat16)     # (64, TB)

    # value: Linear(64, 256) -> ReLU  (keep f32 for the VPU/XLU head below)
    a = jnp.dot(w4_ref[...], h, preferred_element_type=jnp.float32) + b4_ref[...]
    h = jnp.maximum(a, 0.0)                          # (256, TB) f32

    # value: Linear(256, 1) as VPU multiply + XLU sublane-reduce -> (1, TB)
    v = jnp.sum(h * w5_ref[...], axis=0, keepdims=True) + b5_ref[...]
    out_ref[...] = v.astype(out_ref.dtype)           # lane-dense full-width store


def critic_forward(x, params, *, tb=256):
    """x: (B, state_dim) f32. params: PyTorch-layout [(w (out,in), b (out,)), ...].

    Returns (B, 1) f32 state values.
    """
    B, state_dim = x.shape
    (w1, b1), (w2, b2), (w3, b3), (w4, b4), (w5, b5) = params

    num_tiles = pl.cdiv(B, tb)
    b_pad = num_tiles * tb

    # Feature-major, batch-on-lanes layout; pad batch to a multiple of the tile.
    xt = jnp.transpose(x).astype(jnp.bfloat16)       # (state_dim, B)
    if b_pad != B:
        xt = jnp.pad(xt, ((0, 0), (0, b_pad - B)))

    def col(b):
        return b.reshape(-1, 1).astype(jnp.float32)  # bias as (out, 1) column

    operands = [
        xt,
        w1.astype(jnp.bfloat16), col(b1),
        w2.astype(jnp.bfloat16), col(b2),
        w3.astype(jnp.bfloat16), col(b3),
        w4.astype(jnp.bfloat16), col(b4),
        jnp.transpose(w5).astype(jnp.float32),       # (256, 1) f32 for VPU head
        col(b5),                                     # (1, 1) f32
    ]

    def resident_spec(shape):
        # Weights/biases: same block every grid step -> kept resident in VMEM.
        return pl.BlockSpec(shape, lambda i: (0, 0))

    in_specs = [pl.BlockSpec((state_dim, tb), lambda i: (0, i))]
    in_specs += [resident_spec(o.shape) for o in operands[1:]]

    out = pl.pallas_call(
        critic_kernel,
        out_shape=jax.ShapeDtypeStruct((1, b_pad), jnp.float32),
        grid=(num_tiles,),
        in_specs=in_specs,
        out_specs=pl.BlockSpec((1, tb), lambda i: (0, i)),
        compiler_params=pltpu.CompilerParams(
            dimension_semantics=("parallel",),       # megacore sharding on v7x
            vmem_limit_bytes=32 * 1024 * 1024,       # generous; kernel uses <1 MiB
        ),
    )(*operands)

    return out[0, :B].reshape(B, 1)


def xavier_uniform_relu(key, fan_out, fan_in):
    """nn.init.xavier_uniform_ with gain = calculate_gain('relu') = sqrt(2)."""
    gain = math.sqrt(2.0)
    bound = gain * math.sqrt(6.0 / (fan_in + fan_out))
    return jax.random.uniform(key, (fan_out, fan_in), jnp.float32, -bound, bound)


def make_params(key, state_dim):
    """PyTorch layout: weight (out_features, in_features), bias (out_features,)."""
    dims = [(state_dim, 64), (64, 128), (128, 64), (64, 256), (256, 1)]
    params = []
    for fi, fo in dims:
        key, sub = jax.random.split(key)
        w = xavier_uniform_relu(sub, fo, fi)
        b = jnp.full((fo,), 0.1, dtype=jnp.float32)  # nn.init.constant_(bias, 0.1)
        params.append((w, b))
    return params


def critic_ref(x, params):
    """Reference mimicking the kernel's precision (bf16 matmul operands, f32 accum)."""
    (w1, b1), (w2, b2), (w3, b3), (w4, b4), (w5, b5) = params
    h = x.astype(jnp.bfloat16)
    for w, b in ((w1, b1), (w2, b2), (w3, b3)):
        a = jnp.dot(h, w.T.astype(jnp.bfloat16),
                    preferred_element_type=jnp.float32) + b
        h = jnp.maximum(a, 0.0).astype(jnp.bfloat16)
    a = jnp.dot(h, w4.T.astype(jnp.bfloat16),
                preferred_element_type=jnp.float32) + b4
    h = jnp.maximum(a, 0.0)                          # (B, 256) f32
    return jnp.dot(h, w5.T) + b5                     # (B, 1) f32


if __name__ == "__main__":
    key = jax.random.PRNGKey(0)
    state_dim = 8
    batch = 300   # deliberately not a multiple of the 256-wide batch tile

    k_x, k_p = jax.random.split(key)
    x = jax.random.normal(k_x, (batch, state_dim), dtype=jnp.float32)
    params = make_params(k_p, state_dim)

    value = critic_forward(x, params)
    value = jax.block_until_ready(value)

    ref = critic_ref(x, params)
    assert value.shape == (batch, 1), value.shape
    max_err = float(jnp.max(jnp.abs(value - ref)))
    assert jnp.allclose(value, ref, atol=2e-3, rtol=2e-3), max_err

    print("KERNEL_OK")
</pallas_src>

<mosaic_0001>
module attributes {stable_mosaic.version = 11 : i64} {
  func.func @critic_kernel(%arg0: i32, %arg1: memref<8x256xbf16, #tpu.memory_space<vmem>>, %arg2: memref<64x8xbf16, #tpu.memory_space<vmem>>, %arg3: memref<64x1xf32, #tpu.memory_space<vmem>>, %arg4: memref<128x64xbf16, #tpu.memory_space<vmem>>, %arg5: memref<128x1xf32, #tpu.memory_space<vmem>>, %arg6: memref<64x128xbf16, #tpu.memory_space<vmem>>, %arg7: memref<64x1xf32, #tpu.memory_space<vmem>>, %arg8: memref<256x64xbf16, #tpu.memory_space<vmem>>, %arg9: memref<256x1xf32, #tpu.memory_space<vmem>>, %arg10: memref<256x1xf32, #tpu.memory_space<vmem>>, %arg11: memref<1x1xf32, #tpu.memory_space<vmem>>, %arg12: memref<1x256xf32, #tpu.memory_space<vmem>>) attributes {dimension_semantics = [#tpu.dimension_semantics<parallel>], iteration_bounds = array<i64: 2>, scalar_prefetch = 0 : i64, scratch_operands = 0 : i64, tpu.core_type = #tpu.core_type<tc>, window_params = [{transform_indices = @transform_0, window_bounds = array<i64: 8, 256>}, {pipeline_mode = #tpu.pipeline_mode<synchronous>, transform_indices = @transform_1, window_bounds = array<i64: 64, 8>}, {pipeline_mode = #tpu.pipeline_mode<synchronous>, transform_indices = @transform_2, window_bounds = array<i64: 64, 1>}, {pipeline_mode = #tpu.pipeline_mode<synchronous>, transform_indices = @transform_3, window_bounds = array<i64: 128, 64>}, {pipeline_mode = #tpu.pipeline_mode<synchronous>, transform_indices = @transform_4, window_bounds = array<i64: 128, 1>}, {pipeline_mode = #tpu.pipeline_mode<synchronous>, transform_indices = @transform_5, window_bounds = array<i64: 64, 128>}, {pipeline_mode = #tpu.pipeline_mode<synchronous>, transform_indices = @transform_6, window_bounds = array<i64: 64, 1>}, {pipeline_mode = #tpu.pipeline_mode<synchronous>, transform_indices = @transform_7, window_bounds = array<i64: 256, 64>}, {pipeline_mode = #tpu.pipeline_mode<synchronous>, transform_indices = @transform_8, window_bounds = array<i64: 256, 1>}, {pipeline_mode = #tpu.pipeline_mode<synchronous>, transform_indices = @transform_9, window_bounds = array<i64: 256, 1>}, {pipeline_mode = #tpu.pipeline_mode<synchronous>, transform_indices = @transform_10, window_bounds = array<i64: 1, 1>}, {transform_indices = @transform_11, window_bounds = array<i64: 1, 256>}]} {
    %c0 = arith.constant 0 : index
    %c0_0 = arith.constant 0 : index
    %0 = vector.load %arg1[%c0, %c0_0] : memref<8x256xbf16, #tpu.memory_space<vmem>>, vector<8x256xbf16>
    %c0_1 = arith.constant 0 : index
    %c0_2 = arith.constant 0 : index
    %1 = vector.load %arg2[%c0_1, %c0_2] : memref<64x8xbf16, #tpu.memory_space<vmem>>, vector<64x8xbf16>
    %cst = arith.constant dense<0.000000e+00> : vector<64x256xf32>
    %2 = tpu.matmul %1, %0, %cst {dimension_numbers = #tpu.dot_dimension_numbers<[1], [0], [0], [1], [0, 0, 1, 1], [], []>} : vector<64x8xbf16>, vector<8x256xbf16>, vector<64x256xf32> -> vector<64x256xf32>
    %c0_3 = arith.constant 0 : index
    %c0_4 = arith.constant 0 : index
    %3 = vector.load %arg3[%c0_3, %c0_4] : memref<64x1xf32, #tpu.memory_space<vmem>>, vector<64x1xf32>
    %4 = vector.broadcast %3 : vector<64x1xf32> to vector<64x256xf32>
    %5 = arith.addf %2, %4 : vector<64x256xf32>
    %cst_5 = arith.constant 0.000000e+00 : f32
    %6 = vector.broadcast %cst_5 : f32 to vector<64x256xf32>
    %7 = arith.maximumf %5, %6 : vector<64x256xf32>
    %8 = arith.truncf %7 : vector<64x256xf32> to vector<64x256xbf16>
    %c0_6 = arith.constant 0 : index
    %c0_7 = arith.constant 0 : index
    %9 = vector.load %arg4[%c0_6, %c0_7] : memref<128x64xbf16, #tpu.memory_space<vmem>>, vector<128x64xbf16>
    %cst_8 = arith.constant dense<0.000000e+00> : vector<128x256xf32>
    %10 = tpu.matmul %9, %8, %cst_8 {dimension_numbers = #tpu.dot_dimension_numbers<[1], [0], [0], [1], [0, 0, 1, 1], [], []>} : vector<128x64xbf16>, vector<64x256xbf16>, vector<128x256xf32> -> vector<128x256xf32>
    %c0_9 = arith.constant 0 : index
    %c0_10 = arith.constant 0 : index
    %11 = vector.load %arg5[%c0_9, %c0_10] : memref<128x1xf32, #tpu.memory_space<vmem>>, vector<128x1xf32>
    %12 = vector.broadcast %11 : vector<128x1xf32> to vector<128x256xf32>
    %13 = arith.addf %10, %12 : vector<128x256xf32>
    %cst_11 = arith.constant 0.000000e+00 : f32
    %14 = vector.broadcast %cst_11 : f32 to vector<128x256xf32>
    %15 = arith.maximumf %13, %14 : vector<128x256xf32>
    %16 = arith.truncf %15 : vector<128x256xf32> to vector<128x256xbf16>
    %c0_12 = arith.constant 0 : index
    %c0_13 = arith.constant 0 : index
    %17 = vector.load %arg6[%c0_12, %c0_13] : memref<64x128xbf16, #tpu.memory_space<vmem>>, vector<64x128xbf16>
    %cst_14 = arith.constant dense<0.000000e+00> : vector<64x256xf32>
    %18 = tpu.matmul %17, %16, %cst_14 {dimension_numbers = #tpu.dot_dimension_numbers<[1], [0], [0], [1], [0, 0, 1, 1], [], []>} : vector<64x128xbf16>, vector<128x256xbf16>, vector<64x256xf32> -> vector<64x256xf32>
    %c0_15 = arith.constant 0 : index
    %c0_16 = arith.constant 0 : index
    %19 = vector.load %arg7[%c0_15, %c0_16] : memref<64x1xf32, #tpu.memory_space<vmem>>, vector<64x1xf32>
    %20 = vector.broadcast %19 : vector<64x1xf32> to vector<64x256xf32>
    %21 = arith.addf %18, %20 : vector<64x256xf32>
    %cst_17 = arith.constant 0.000000e+00 : f32
    %22 = vector.broadcast %cst_17 : f32 to vector<64x256xf32>
    %23 = arith.maximumf %21, %22 : vector<64x256xf32>
    %24 = arith.truncf %23 : vector<64x256xf32> to vector<64x256xbf16>
    %c0_18 = arith.constant 0 : index
    %c0_19 = arith.constant 0 : index
    %25 = vector.load %arg8[%c0_18, %c0_19] : memref<256x64xbf16, #tpu.memory_space<vmem>>, vector<256x64xbf16>
    %cst_20 = arith.constant dense<0.000000e+00> : vector<256x256xf32>
    %26 = tpu.matmul %25, %24, %cst_20 {dimension_numbers = #tpu.dot_dimension_numbers<[1], [0], [0], [1], [0, 0, 1, 1], [], []>} : vector<256x64xbf16>, vector<64x256xbf16>, vector<256x256xf32> -> vector<256x256xf32>
    %c0_21 = arith.constant 0 : index
    %c0_22 = arith.constant 0 : index
    %27 = vector.load %arg9[%c0_21, %c0_22] : memref<256x1xf32, #tpu.memory_space<vmem>>, vector<256x1xf32>
    %28 = vector.broadcast %27 : vector<256x1xf32> to vector<256x256xf32>
    %29 = arith.addf %26, %28 : vector<256x256xf32>
    %cst_23 = arith.constant 0.000000e+00 : f32
    %30 = vector.broadcast %cst_23 : f32 to vector<256x256xf32>
    %31 = arith.maximumf %29, %30 : vector<256x256xf32>
    %c0_24 = arith.constant 0 : index
    %c0_25 = arith.constant 0 : index
    %32 = vector.load %arg10[%c0_24, %c0_25] : memref<256x1xf32, #tpu.memory_space<vmem>>, vector<256x1xf32>
    %33 = vector.broadcast %32 : vector<256x1xf32> to vector<256x256xf32>
    %34 = arith.mulf %31, %33 : vector<256x256xf32>
    %cst_26 = arith.constant dense<0.000000e+00> : vector<256xf32>
    %35 = vector.multi_reduction <add>, %34, %cst_26 [0] : vector<256x256xf32> to vector<256xf32>
    %36 = vector.shape_cast %35 : vector<256xf32> to vector<1x256xf32>
    %c0_27 = arith.constant 0 : index
    %c0_28 = arith.constant 0 : index
    %37 = vector.load %arg11[%c0_27, %c0_28] : memref<1x1xf32, #tpu.memory_space<vmem>>, vector<1x1xf32>
    %38 = vector.broadcast %37 : vector<1x1xf32> to vector<1x256xf32>
    %39 = arith.addf %36, %38 : vector<1x256xf32>
    %c0_29 = arith.constant 0 : index
    %c0_30 = arith.constant 0 : index
    %40 = vector.load %arg12[%c0_29, %c0_30] : memref<1x256xf32, #tpu.memory_space<vmem>>, vector<1x256xf32>
    tpu.vector_store %arg12[%c0_29, %c0_30], %39 {strides = array<i32>} : memref<1x256xf32, #tpu.memory_space<vmem>>, vector<1x256xf32>,
    return
  }
  func.func @transform_0(%arg0: i32) -> (i32, i32) {
    %c0_i32 = arith.constant 0 : i32
    %c0_i32_0 = arith.constant 0 : i32
    return %c0_i32, %arg0 : i32, i32
  }
  func.func @transform_1(%arg0: i32) -> (i32, i32) {
    %c0_i32 = arith.constant 0 : i32
    %c0_i32_0 = arith.constant 0 : i32
    %c0_i32_1 = arith.constant 0 : i32
    return %c0_i32, %c0_i32_0 : i32, i32
  }
  func.func @transform_2(%arg0: i32) -> (i32, i32) {
    %c0_i32 = arith.constant 0 : i32
    %c0_i32_0 = arith.constant 0 : i32
    %c0_i32_1 = arith.constant 0 : i32
    return %c0_i32, %c0_i32_0 : i32, i32
  }
  func.func @transform_3(%arg0: i32) -> (i32, i32) {
    %c0_i32 = arith.constant 0 : i32
    %c0_i32_0 = arith.constant 0 : i32
    %c0_i32_1 = arith.constant 0 : i32
    return %c0_i32, %c0_i32_0 : i32, i32
  }
  func.func @transform_4(%arg0: i32) -> (i32, i32) {
    %c0_i32 = arith.constant 0 : i32
    %c0_i32_0 = arith.constant 0 : i32
    %c0_i32_1 = arith.constant 0 : i32
    return %c0_i32, %c0_i32_0 : i32, i32
  }
  func.func @transform_5(%arg0: i32) -> (i32, i32) {
    %c0_i32 = arith.constant 0 : i32
    %c0_i32_0 = arith.constant 0 : i32
    %c0_i32_1 = arith.constant 0 : i32
    return %c0_i32, %c0_i32_0 : i32, i32
  }
  func.func @transform_6(%arg0: i32) -> (i32, i32) {
    %c0_i32 = arith.constant 0 : i32
    %c0_i32_0 = arith.constant 0 : i32
    %c0_i32_1 = arith.constant 0 : i32
    return %c0_i32, %c0_i32_0 : i32, i32
  }
  func.func @transform_7(%arg0: i32) -> (i32, i32) {
    %c0_i32 = arith.constant 0 : i32
    %c0_i32_0 = arith.constant 0 : i32
    %c0_i32_1 = arith.constant 0 : i32
    return %c0_i32, %c0_i32_0 : i32, i32
  }
  func.func @transform_8(%arg0: i32) -> (i32, i32) {
    %c0_i32 = arith.constant 0 : i32
    %c0_i32_0 = arith.constant 0 : i32
    %c0_i32_1 = arith.constant 0 : i32
    return %c0_i32, %c0_i32_0 : i32, i32
  }
  func.func @transform_9(%arg0: i32) -> (i32, i32) {
    %c0_i32 = arith.constant 0 : i32
    %c0_i32_0 = arith.constant 0 : i32
    %c0_i32_1 = arith.constant 0 : i32
    return %c0_i32, %c0_i32_0 : i32, i32
  }
  func.func @transform_10(%arg0: i32) -> (i32, i32) {
    %c0_i32 = arith.constant 0 : i32
    %c0_i32_0 = arith.constant 0 : i32
    %c0_i32_1 = arith.constant 0 : i32
    return %c0_i32, %c0_i32_0 : i32, i32
  }
  func.func @transform_11(%arg0: i32) -> (i32, i32) {
    %c0_i32 = arith.constant 0 : i32
    %c0_i32_0 = arith.constant 0 : i32
    return %c0_i32, %arg0 : i32, i32
  }
}

</mosaic_0001>

<bundles_post_ra>
// kernel: tpu_custom_call.1
= control target key start
LH: loop header
LB: loop body
LE: loop exit
PB: predicated region body
PF: predicated region fallthrough
CT: control target
= control target key end

     0   :  { %s3269_s0 = inlined_call_operand.vmem [shape: bf16[8,512], index: 0, kind: input, shape index: {}]   ;;  %s3270_s1 = inlined_call_operand.vmem [shape: bf16[64,8], index: 1, kind: input, shape index: {}]   ;;  %s3271_s2 = inlined_call_operand.vmem [shape: f32[64,1], index: 2, kind: input, shape index: {}]   ;;  %s3272_s3 = inlined_call_operand.vmem [shape: bf16[128,64], index: 3, kind: input, shape index: {}]   ;;  %s3273_s4 = inlined_call_operand.vmem [shape: f32[128,1], index: 4, kind: input, shape index: {}]   ;;  %s3274_s5 = inlined_call_operand.vmem [shape: bf16[64,128], index: 5, kind: input, shape index: {}]   ;;  %s3275_s6 = inlined_call_operand.vmem [shape: f32[64,1], index: 6, kind: input, shape index: {}]   ;;  %s3276_s7 = inlined_call_operand.vmem [shape: bf16[256,64], index: 7, kind: input, shape index: {}]   ;;  %s3277_s8 = inlined_call_operand.vmem [shape: f32[256,1], index: 8, kind: input, shape index: {}]   ;;  %s3278_s9 = inlined_call_operand.vmem [shape: f32[256,1], index: 9, kind: input, shape index: {}]   ;;  %s3279_s10 = inlined_call_operand.<no memory space> [shape: f32[1,1], index: 10, kind: input, shape index: {}]   ;;  %s3280_s11 = inlined_call_operand.hbm [shape: f32[1,512], index: 11, kind: output, shape index: {}]  }
   0x1   :  { %v16_v0 = vstv %s3279_s10 }
   0x2   :  { %17 = vst [vmem:[#allocation2] sm:$0x1] %v16_v0 }
   0x3   :  { %18 = vsyncpa [#allocation4], 0 }
   0x4   :  { %20 = vsyncpa [#allocation4 + $0x1], 0  ;;  %s2444_s19 = smov 0   ;;  %s2446_s20 = smov 0  }
   0x5   :  { %s2448_s21 = smov 0   ;;  %s2450_s22 = smov 0  }
   0x6 LB: > { %s2465_s10 = sadd.s32 4294967295, %s2376_s22   ;;  %s2153_s23 = sadd.s32 4294967294, %s2376_s22   ;;  %s2376_s22 = sphi %s2450_s22, %s3303_s22   ;;  %s2372_s21 = sphi %s2448_s21, %s3302_s21   ;;  %s2368_s20 = sphi %s2446_s20, %s3301_s20   ;;  %s2364_s19 = sphi %s2444_s19, %s3300_s19  }
   0x7   : > { %s2469_s24 = sadd.s32 1, %s2376_s22   ;;  %s269_s25 = sadd.s32 1, %s2372_s21 }
   0x8   : > { %s266_s26 = ssub.s32 %s2376_s22, %s2469_s24  ;;  %p279_p0 = scmp.ne.s32.totalorder %s2372_s21, %s2368_s20 }
   0x9   : > { %p267_p1 = scmp.eq.s32.totalorder %s266_s26, 0  ;;  %p280_p2 = scmp.eq.s32.totalorder %s2465_s10, 1 }
   0xa   : > { %p285_p3 = scmp.ne.s32.totalorder %s2368_s20, %s2364_s19  ;;  %p286_p4 = scmp.eq.s32.totalorder %s2153_s23, 1 }
   0xb   : > { %s2480_s27 = scalar_select %p267_p1, %s2372_s21, %s269_s25  }
   0xc   : > { %p2482_p5 = por %p280_p2, %p279_p0  ;;  %p2486_p6 = por %p286_p4, %p285_p3 }
   0xd   : > { %p2156_p7 = scmp.ge.s32.totalorder %s2376_s22, 1  ;;  %p343_p8 = scmp.lt.s32.totalorder %s2376_s22, 3 }
   0xf   : > { %p344_p9 = pnand %p2156_p7, %p343_p8 }
  0x11   : > { %347 = sbr.rel (%p344_p9) target bundleno = 1167 (0x48f), region = 64 }
  0x18   : > { %v402_v1 = vld [vmem:[%s3271_s2 + $0x10] sm:$0xff]  ;;  %v400_v2 = vld [vmem:[%s3271_s2] sm:$0xff]  ;;  %s2158_s15 = sshll.u32 %s2465_s10, 1  ;;  %v2378_v3 = vmov 0   ;;  %v403_v4 = vld [vmem:[%s3271_s2 + $0x18] sm:$0xff]  ;;  %vm486_vm0 = vcmask 1043456  }
  0x19   : > { %2279 = vset.pattern.permute.xlu1 %v2378_v3  ;;  %2278 = vset.pattern.permute.xlu0 %v2378_v3  ;;  %p384_p10 = scmp.lt.s32.totalorder %s2158_s15, 3  ;;  %v401_v5 = vld [vmem:[%s3271_s2 + $0x8] sm:$0xff]  ;;  %v404_v7 = vld [vmem:[%s3271_s2 + $0x20] sm:$0xff]  ;;  %v407_v12 = vld [vmem:[%s3271_s2 + $0x38] sm:$0xff]  ;;  %vm473_vm1 = vcmask 64512   ;;  %vm742_vm2 = vcmask 523264  }
  0x1a   : > { %420 = vperm.xlu1 %2279, %v402_v1   ;;  %410 = vperm.xlu0 %2278, %v400_v2   ;;  %v405_v6 = vld [vmem:[%s3271_s2 + $0x28] sm:$0xff]  ;;  %v406_v13 = vld [vmem:[%s3271_s2 + $0x30] sm:$0xff]  ;;  %v2282_v14 = vld [vmem:[%s3270_s1] sm:$0xff]   ;;  %s380_s23 = sand.u32 1, %s2368_s20  }
  0x1b   : > { %s3305_s15 = smov (!%p384_p10, %s2158_s15), 3  ;;  %525 = vmatprep.mubr.bf16.mxu0 %v2378_v3  ;;  %799 = vmatprep.mubr.bf16.mxu1 %v2378_v3  ;;  %v607_v15 = vld [vmem:[%s3273_s4 + $0x8] sm:$0xff]  ;;  %v606_v16 = vld [vmem:[%s3273_s4] sm:$0xff]  ;;  %v609_v17 = vld [vmem:[%s3273_s4 + $0x18] sm:$0xff]  ;;  %s2157_s26 = sshll.u32 %s380_s23, 1 }
  0x1c   : > { %s2159_s25 = sshll.u32 %s3305_s15, 2  ;;  %v608_v18 = vld [vmem:[%s3273_s4 + $0x10] sm:$0xff]  ;;  %v2283_v19 = vld [vmem:[%s3270_s1 + $0x8] sm:$0xff]   ;;  %v610_v21 = vld [vmem:[%s3273_s4 + $0x20] sm:$0xff]  ;;  %s382_s30 = scalar_lea.vmem [#allocation3], %s2157_s26 }
  0x1d   : > { %s387_s14 = scalar_lea.vmem %s3269_s0, %s2159_s25  ;;  %v611_v20 = vld [vmem:[%s3273_s4 + $0x28] sm:$0xff]  ;;  %v613_v22 = vld [vmem:[%s3273_s4 + $0x38] sm:$0xff]  ;;  %v612_v23 = vld [vmem:[%s3273_s4 + $0x30] sm:$0xff]  ;;  %s2228_s25 = sshll.u32 %s2465_s10, 5 }
  0x1e   : > { %425 = vperm.xlu1 %2279, %v403_v4   ;;  %415 = vperm.xlu0 %2278, %v401_v5   ;;  %v391_v8 = vld [vmem:[%s387_s14] sm:$0xff]  ;;  %v2284_v24 = vld [vmem:[%s3270_s1 + $0x10] sm:$0xff]   ;;  %v615_v25 = vld [vmem:[%s3273_s4 + $0x48] sm:$0xff]  ;;  %s2094_s12 = sshll.u32 %s382_s30, 4  ;;  %s3227_s16 = scalar_lea.hbm %s3280_s11, %s2228_s25  ;;  %s3229_s12 = int_to_ptr.vmem [resolvable:$true] %s2094_s12 }
  0x1f   : > { %v2165_v9 = vcombine.high %v391_v8, %v391_v8  ;;  %v2164_v10 = vcombine.low %v391_v8, %v391_v8  ;;  %v614_v26 = vld [vmem:[%s3273_s4 + $0x40] sm:$0xff]  ;;  %v617_v27 = vld [vmem:[%s3273_s4 + $0x58] sm:$0xff]  ;;  %v616_v28 = vld [vmem:[%s3273_s4 + $0x50] sm:$0xff]  ;;  %s2080_s17 = scalar_lea.sflag [#allocation4], %s380_s23  ;;  %s2314_s15 = scalar_lea.vmem %s3229_s12, 32 }
  0x20   : > { %v2285_v29 = vld [vmem:[%s3270_s1 + $0x18] sm:$0xff]   ;;  %v619_v30 = vld [vmem:[%s3273_s4 + $0x68] sm:$0xff]  ;;  %v618_v31 = vld [vmem:[%s3273_s4 + $0x60] sm:$0xff]  ;;  %p2315_p11 = scmp.ne.s32.totalorder %s3229_s12, %s2314_s15  ;;  %s2380_s10 = smov [#allocation3]  }
  0x21   : > { %v488_v11 = vsel %vm486_vm0, %v2164_v10, 0  ;;  %2166 = vmatprep.subr.msk.bf16.mxu0 %vm486_vm0, %v2165_v9  ;;  %v621_v32 = vld [vmem:[%s3273_s4 + $0x78] sm:$0xff]  ;;  %v620_v33 = vld [vmem:[%s3273_s4 + $0x70] sm:$0xff]  ;;  %v937_v34 = vld [vmem:[%s3275_s6 + $0x8] sm:$0xff]  ;;  %s2318_s18 = sshll.u32 %s2380_s10, 4  ;;  %s2319_s18 = int_to_ptr.vmem [resolvable:$false] %s2318_s18 }
  0x22   : > { %435 = vperm.xlu1 %2279, %v405_v6   ;;  %430 = vperm.xlu0 %2278, %v404_v7   ;;  %v936_v35 = vld [vmem:[%s3275_s6] sm:$0xff]  ;;  %v939_v36 = vld [vmem:[%s3275_s6 + $0x18] sm:$0xff]  ;;  %v938_v37 = vld [vmem:[%s3275_s6 + $0x10] sm:$0xff]  ;;  %p2316_p12 = pnand %p2315_p11, %p2482_p5  ;;  %s2320_s26 = scalar_lea.vmem %s2319_s18, 64 }
  0x23   : > { %494 = vmatpush1.bf16.msra.mxu0 %v488_v11  ;;  %v941_v38 = vld [vmem:[%s3275_s6 + $0x28] sm:$0xff]  ;;  %v940_v39 = vld [vmem:[%s3275_s6 + $0x20] sm:$0xff]  ;;  %v943_v40 = vld [vmem:[%s3275_s6 + $0x38] sm:$0xff]  ;;  %p2321_p0 = scmp.lt.s32.totalorder %s3229_s12, %s2319_s18  ;;  %p2322_p1 = scmp.lt.s32.totalorder %s2320_s26, %s2314_s15 }
  0x24   : > { %v942_v41 = vld [vmem:[%s3275_s6 + $0x30] sm:$0xff]  ;;  %v1138_v42 = vld [vmem:[%s3277_s8 + $0x8] sm:$0xff]  ;;  %v1137_v43 = vld [vmem:[%s3277_s8] sm:$0xff]  ;;  %p2317_p13 = pneg %p2316_p12 }
  0x25   : > { %v1140_v44 = vld [vmem:[%s3277_s8 + $0x18] sm:$0xff]  ;;  %v1139_v45 = vld [vmem:[%s3277_s8 + $0x10] sm:$0xff]  ;;  %v1142_v46 = vld [vmem:[%s3277_s8 + $0x28] sm:$0xff]  ;;  %p2323_p2 = por %p2322_p1, %p2321_p0 }
  0x26   : > { %445 = vperm.xlu1 %2279, %v407_v12   ;;  %440 = vperm.xlu0 %2278, %v406_v13   ;;  %v1141_v47 = vld [vmem:[%s3277_s8 + $0x20] sm:$0xff]  ;;  %v1144_v48 = vld [vmem:[%s3277_s8 + $0x38] sm:$0xff]  ;;  %v1143_v49 = vld [vmem:[%s3277_s8 + $0x30] sm:$0xff] }
  0x27   : > { %2167 = vmatmul.mubr.msk.bf16.vlgmr.msra.gmra.mrb[0].mxu0 %vm473_vm1, %v2282_v14  ;;  %v1146_v50 = vld [vmem:[%s3277_s8 + $0x48] sm:$0xff]  ;;  %v1145_v51 = vld [vmem:[%s3277_s8 + $0x40] sm:$0xff]  ;;  %v1148_v52 = vld [vmem:[%s3277_s8 + $0x58] sm:$0xff]  ;;  %p2324_p3 = pnand %p2323_p2, %p2317_p13 }
  0x28   : > { %535 = vmatprep.mubr.bf16.mxu0 %v2378_v3  ;;  %v1147_v53 = vld [vmem:[%s3277_s8 + $0x50] sm:$0xff]  ;;  %v1150_v54 = vld [vmem:[%s3277_s8 + $0x68] sm:$0xff]  ;;  %v1149_v55 = vld [vmem:[%s3277_s8 + $0x60] sm:$0xff] }
  0x29   : > { %v1152_v56 = vld [vmem:[%s3277_s8 + $0x78] sm:$0xff]  ;;  %v1151_v57 = vld [vmem:[%s3277_s8 + $0x70] sm:$0xff]  ;;  %v1154_v58 = vld [vmem:[%s3277_s8 + $0x88] sm:$0xff] }
  0x2a   : > { %629 = vperm.xlu1 %2279, %v607_v15   ;;  %624 = vperm.xlu0 %2278, %v606_v16   ;;  %v1153_v59 = vld [vmem:[%s3277_s8 + $0x80] sm:$0xff]  ;;  %v1156_v60 = vld [vmem:[%s3277_s8 + $0x98] sm:$0xff]  ;;  %v1155_v61 = vld [vmem:[%s3277_s8 + $0x90] sm:$0xff] }
  0x2b   : > { %v1158_v62 = vld [vmem:[%s3277_s8 + $0xa8] sm:$0xff]  ;;  %v1157_v63 = vld [vmem:[%s3277_s8 + $0xa0] sm:$0xff]  ;;  %v1160_v0 = vld [vmem:[%s3277_s8 + $0xb8] sm:$0xff] }
  0x2c   : > { %v1159_v1 = vld [vmem:[%s3277_s8 + $0xb0] sm:$0xff]  ;;  %v1162_v2 = vld [vmem:[%s3277_s8 + $0xc8] sm:$0xff]  ;;  %v1161_v4 = vld [vmem:[%s3277_s8 + $0xc0] sm:$0xff] }
  0x2d   : > { %v1164_v5 = vld [vmem:[%s3277_s8 + $0xd8] sm:$0xff]  ;;  %v1163_v6 = vld [vmem:[%s3277_s8 + $0xd0] sm:$0xff]  ;;  %v1715_v7 = vld [vmem:[%s3278_s9 + $0x8] sm:$0xff] }
  0x2e   : > { %639 = vperm.xlu1 %2279, %v609_v17   ;;  %634 = vperm.xlu0 %2278, %v608_v18   ;;  %v1714_v8 = vld [vmem:[%s3278_s9] sm:$0xff]  ;;  %v1717_v9 = vld [vmem:[%s3278_s9 + $0x18] sm:$0xff]  ;;  %v1716_v10 = vld [vmem:[%s3278_s9 + $0x10] sm:$0xff] }
  0x2f   : > { %2168 = vmatmul.mubr.msk.bf16.gmra.mrb[4].mxu0 %vm473_vm1, %v2283_v19  ;;  %v1719_v11 = vld [vmem:[%s3278_s9 + $0x28] sm:$0xff]  ;;  %v1718_v12 = vld [vmem:[%s3278_s9 + $0x20] sm:$0xff]  ;;  %v1721_v13 = vld [vmem:[%s3278_s9 + $0x38] sm:$0xff] }
  0x30   : > { %545 = vmatprep.mubr.bf16.mxu0 %v2378_v3  ;;  %v1720_v14 = vld [vmem:[%s3278_s9 + $0x30] sm:$0xff]  ;;  %v1723_v15 = vld [vmem:[%s3278_s9 + $0x48] sm:$0xff]  ;;  %v1722_v16 = vld [vmem:[%s3278_s9 + $0x40] sm:$0xff] }
  0x31   : > { %v1725_v17 = vld [vmem:[%s3278_s9 + $0x58] sm:$0xff]  ;;  %v1724_v18 = vld [vmem:[%s3278_s9 + $0x50] sm:$0xff]  ;;  %v1727_v19 = vld [vmem:[%s3278_s9 + $0x68] sm:$0xff] }
  0x32   : > { %649 = vperm.xlu1 %2279, %v611_v20   ;;  %644 = vperm.xlu0 %2278, %v610_v21   ;;  %v1726_v20 = vld [vmem:[%s3278_s9 + $0x60] sm:$0xff]  ;;  %v1729_v21 = vld [vmem:[%s3278_s9 + $0x78] sm:$0xff] }
  0x36   : > { %659 = vperm.xlu1 %2279, %v613_v22   ;;  %654 = vperm.xlu0 %2278, %v612_v23   ;;  %v1728_v22 = vld [vmem:[%s3278_s9 + $0x70] sm:$0xff]  ;;  %v1731_v23 = vld [vmem:[%s3278_s9 + $0x88] sm:$0xff] }
  0x37   : > { %2169 = vmatmul.mubr.msk.bf16.gmra.mrb[8].mxu0 %vm473_vm1, %v2284_v24  ;;  %v1730_v24 = vld [vmem:[%s3278_s9 + $0x80] sm:$0xff] }
  0x38   : > { %555 = vmatprep.mubr.bf16.mxu0 %v2378_v3 }
  0x3a   : > { %669 = vperm.xlu1 %2279, %v615_v25   ;;  %664 = vperm.xlu0 %2278, %v614_v26   ;;  %v1733_v25 = vld [vmem:[%s3278_s9 + $0x98] sm:$0xff]  ;;  %v1732_v26 = vld [vmem:[%s3278_s9 + $0x90] sm:$0xff] }
  0x3e   : > { %679 = vperm.xlu1 %2279, %v617_v27   ;;  %674 = vperm.xlu0 %2278, %v616_v28   ;;  %v1735_v27 = vld [vmem:[%s3278_s9 + $0xa8] sm:$0xff]  ;;  %v1734_v28 = vld [vmem:[%s3278_s9 + $0xa0] sm:$0xff] }
  0x3f   : > { %2170 = vmatmul.mubr.msk.bf16.gmra.mrb[12].mxu0 %vm473_vm1, %v2285_v29  ;;  %v1737_v29 = vld [vmem:[%s3278_s9 + $0xb8] sm:$0xff] }
  0x40   : > { %1040 = vmatprep.mubr.bf16.mxu0 %v2378_v3 }
  0x42   : > { %689 = vperm.xlu1 %2279, %v619_v30   ;;  %684 = vperm.xlu0 %2278, %v618_v31   ;;  %v1736_v30 = vld [vmem:[%s3278_s9 + $0xb0] sm:$0xff]  ;;  %v1739_v31 = vld [vmem:[%s3278_s9 + $0xc8] sm:$0xff] }
  0x46   : > { %699 = vperm.xlu1 %2279, %v621_v32   ;;  %694 = vperm.xlu0 %2278, %v620_v33   ;;  %v1738_v32 = vld [vmem:[%s3278_s9 + $0xc0] sm:$0xff]  ;;  %v1740_v33 = vld [vmem:[%s3278_s9 + $0xd0] sm:$0xff] }
  0x4a   : > { %951 = vperm.xlu1 %2279, %v937_v34   ;;  %946 = vperm.xlu0 %2278, %v936_v35   ;;  %v1165_v34 = vld [vmem:[%s3277_s8 + $0xe0] sm:$0xff]  ;;  %v1741_v35 = vld [vmem:[%s3278_s9 + $0xd8] sm:$0xff] }
  0x4e   : > { %961 = vperm.xlu1 %2279, %v939_v36   ;;  %956 = vperm.xlu0 %2278, %v938_v37   ;;  %v1166_v36 = vld [vmem:[%s3277_s8 + $0xe8] sm:$0xff]  ;;  %v1742_v37 = vld [vmem:[%s3278_s9 + $0xe0] sm:$0xff] }
  0x52   : > { %971 = vperm.xlu1 %2279, %v941_v38   ;;  %966 = vperm.xlu0 %2278, %v940_v39   ;;  %v1167_v38 = vld [vmem:[%s3277_s8 + $0xf0] sm:$0xff]  ;;  %v1743_v39 = vld [vmem:[%s3278_s9 + $0xe8] sm:$0xff] }
  0x56   : > { %981 = vperm.xlu1 %2279, %v943_v40   ;;  %976 = vperm.xlu0 %2278, %v942_v41   ;;  %v1168_v40 = vld [vmem:[%s3277_s8 + $0xf8] sm:$0xff] }
  0x57   : > { %v1745_v41 = vld [vmem:[%s3278_s9 + $0xf8] sm:$0xff] }
  0x5a   : > { %1176 = vperm.xlu1 %2279, %v1138_v42   ;;  %1171 = vperm.xlu0 %2278, %v1137_v43   ;;  %v1744_v42 = vld [vmem:[%s3278_s9 + $0xf0] sm:$0xff]  ;;  %v2044_v43 = vld [vmem:[#allocation2] sm:$0x1] }
  0x5e   : > { %1186 = vperm.xlu1 %2279, %v1140_v44   ;;  %1181 = vperm.xlu0 %2278, %v1139_v45  }
  0x62   : > { %1196 = vperm.xlu1 %2279, %v1142_v46   ;;  %1191 = vperm.xlu0 %2278, %v1141_v47  }
  0x66   : > { %1206 = vperm.xlu1 %2279, %v1144_v48   ;;  %1201 = vperm.xlu0 %2278, %v1143_v49  }
  0x6a   : > { %1216 = vperm.xlu1 %2279, %v1146_v50   ;;  %1211 = vperm.xlu0 %2278, %v1145_v51  }
  0x6e   : > { %1226 = vperm.xlu1 %2279, %v1148_v52   ;;  %1221 = vperm.xlu0 %2278, %v1147_v53  }
  0x72   : > { %1236 = vperm.xlu1 %2279, %v1150_v54   ;;  %1231 = vperm.xlu0 %2278, %v1149_v55  }
  0x76   : > { %1246 = vperm.xlu1 %2279, %v1152_v56   ;;  %1241 = vperm.xlu0 %2278, %v1151_v57  }
  0x7a   : > { %1256 = vperm.xlu1 %2279, %v1154_v58   ;;  %1251 = vperm.xlu0 %2278, %v1153_v59  }
  0x7e   : > { %1266 = vperm.xlu1 %2279, %v1156_v60   ;;  %1261 = vperm.xlu0 %2278, %v1155_v61  }
  0x82   : > { %1276 = vperm.xlu1 %2279, %v1158_v62   ;;  %1271 = vperm.xlu0 %2278, %v1157_v63  }
  0x86   : > { %1286 = vperm.xlu1 %2279, %v1160_v0   ;;  %1281 = vperm.xlu0 %2278, %v1159_v1  }
  0x8a   : > { %1296 = vperm.xlu1 %2279, %v1162_v2   ;;  %1291 = vperm.xlu0 %2278, %v1161_v4  }
  0x8e   : > { %1306 = vperm.xlu1 %2279, %v1164_v5   ;;  %1301 = vperm.xlu0 %2278, %v1163_v6  }
  0x92   : > { %1753 = vperm.xlu1 %2279, %v1715_v7   ;;  %1748 = vperm.xlu0 %2278, %v1714_v8  }
  0x96   : > { %1763 = vperm.xlu1 %2279, %v1717_v9   ;;  %1758 = vperm.xlu0 %2278, %v1716_v10  }
  0x99   : > { %v411_v44 = vpop.permute.xlu0 %410  ;;  %v421_v53 = vpop.permute.xlu1 %420 }
  0x9a   : > { %1773 = vperm.xlu1 %2279, %v1719_v11   ;;  %1768 = vperm.xlu0 %2278, %v1718_v12  }
  0x9d   : > { %v416_v48 = vpop.permute.xlu0 %415  ;;  %v426_v0 = vpop.permute.xlu1 %425 }
  0x9e   : > { %1783 = vperm.xlu1 %2279, %v1721_v13   ;;  %1778 = vperm.xlu0 %2278, %v1720_v14  }
  0xa1   : > { %v431_v12 = vpop.permute.xlu0 %430 }
  0xa2   : > { %1793 = vperm.xlu1 %2279, %v1723_v15   ;;  %1788 = vperm.xlu0 %2278, %v1722_v16  }
  0xa6   : > { %1803 = vperm.xlu1 %2279, %v1725_v17   ;;  %1798 = vperm.xlu0 %2278, %v1724_v18   ;;  %v436_v17 = vpop.permute.xlu1 %435 }
  0xaa   : > { %1813 = vperm.xlu1 %2279, %v1727_v19   ;;  %1808 = vperm.xlu0 %2278, %v1726_v20  }
  0xae   : > { %1823 = vperm.xlu1 %2279, %v1729_v21   ;;  %1818 = vperm.xlu0 %2278, %v1728_v22  }
  0xb2   : > { %1833 = vperm.xlu1 %2279, %v1731_v23   ;;  %1828 = vperm.xlu0 %2278, %v1730_v24  }
  0xb6   : > { %1843 = vperm.xlu1 %2279, %v1733_v25   ;;  %1838 = vperm.xlu0 %2278, %v1732_v26  }
  0xba   : > { %1853 = vperm.xlu1 %2279, %v1735_v27   ;;  %1848 = vperm.xlu0 %2278, %v1734_v28   ;;  %v441_v28 = vpop.permute.xlu0 %440 }
  0xbe   : > { %1863 = vperm.xlu1 %2279, %v1737_v29   ;;  %1858 = vperm.xlu0 %2278, %v1736_v30  }
  0xc2   : > { %1873 = vperm.xlu1 %2279, %v1739_v31   ;;  %1868 = vperm.xlu0 %2278, %v1738_v32  }
  0xc6   : > { %1878 = vperm.xlu1 %2279, %v1740_v33   ;;  %1311 = vperm.xlu0 %2278, %v1165_v34   ;;  %v446_v33 = vpop.permute.xlu1 %445 }
  0xca   : > { %1883 = vperm.xlu1 %2279, %v1741_v35   ;;  %1316 = vperm.xlu0 %2278, %v1166_v36  }
  0xce   : > { %1888 = vperm.xlu1 %2279, %v1742_v37   ;;  %1321 = vperm.xlu0 %2278, %v1167_v38  }
  0xd2   : > { %1893 = vperm.xlu1 %2279, %v1743_v39   ;;  %1326 = vperm.xlu0 %2278, %v1168_v40  }
  0xd6   : > { %1903 = vperm.xlu1 %2279, %v1745_v41   ;;  %1898 = vperm.xlu0 %2278, %v1744_v42  }
  0xda   : > { %2047 = vperm.xlu0 %2278, %v2044_v43  }
  0xfa   : > { %v527_v45 = vpop.f32.mrb[0].mxu0 }
  0xfb   : > { %v528_v46 = vadd.f32 %v527_v45, %v411_v44  ;;  %v529_v47 = vpop.f32.mrb[1].mxu0  ;;  %v2286_v45 = vld [vmem:[%s3272_s3] sm:$0xff]  }
  0xfc   : > { %v530_v49 = vadd.f32 %v529_v47, %v411_v44  ;;  %v531_v50 = vpop.f32.mrb[2].mxu0  ;;  %v2288_v47 = vld [vmem:[%s3272_s3 + $0x10] sm:$0xff]  }
  0xfd   : > { %v532_v51 = vadd.f32 %v531_v50, %v416_v48  ;;  %v533_v52 = vpop.f32.mrb[3].mxu0  ;;  %v566_v55 = vmax.f32 %v528_v46, 0.0  ;;  %v2287_v46 = vld [vmem:[%s3272_s3 + $0x8] sm:$0xff]  }
  0xfe   : > { %v534_v54 = vadd.f32 %v533_v52, %v416_v48  ;;  %v567_v57 = vmax.f32 %v530_v49, 0.0  ;;  %v2289_v48 = vld [vmem:[%s3272_s3 + $0x18] sm:$0xff]   ;;  %v2290_v49 = vld [vmem:[%s3272_s3 + $0x20] sm:$0xff]   ;;  %v2291_v50 = vld [vmem:[%s3272_s3 + $0x28] sm:$0xff]  }
  0xff   : > { %v568_v56 = vmax.f32 %v532_v51, 0.0  ;;  %v2292_v51 = vld [vmem:[%s3272_s3 + $0x30] sm:$0xff]   ;;  %v2293_v52 = vld [vmem:[%s3272_s3 + $0x38] sm:$0xff]  }
 0x100   : > { %v569_v58 = vmax.f32 %v534_v54, 0.0 }
 0x101   : > { %v582_v59 = vpack.c.bf16 %v568_v56, %v566_v55 }
 0x102   : > { %v537_v60 = vpop.f32.mrb[4].mxu0  ;;  %v583_v61 = vpack.c.bf16 %v569_v58, %v567_v57  ;;  %v630_v57 = vpop.permute.xlu1 %629 }
 0x103   : > { %v538_v62 = vadd.f32 %v537_v60, %v421_v53  ;;  %v539_v63 = vpop.f32.mrb[5].mxu0 }
 0x104   : > { %v540_v1 = vadd.f32 %v539_v63, %v421_v53  ;;  %v541_v2 = vpop.f32.mrb[6].mxu0  ;;  %767 = vmatprep.subr.bf16.mxu1 %v583_v61  ;;  %v625_v53 = vpop.permute.xlu0 %624 }
 0x105   : > { %v542_v4 = vadd.f32 %v541_v2, %v426_v0  ;;  %v543_v5 = vpop.f32.mrb[7].mxu0  ;;  %768 = vmatpush1.bf16.msra.mxu1 %v582_v59  ;;  %v570_v7 = vmax.f32 %v538_v62, 0.0 }
 0x106   : > { %v544_v6 = vadd.f32 %v543_v5, %v426_v0  ;;  %v571_v9 = vmax.f32 %v540_v1, 0.0 }
 0x107   : > { %v572_v8 = vmax.f32 %v542_v4, 0.0 }
 0x108   : > { %v573_v10 = vmax.f32 %v544_v6, 0.0  ;;  %v635_v5 = vpop.permute.xlu0 %634 }
 0x109   : > { %v584_v11 = vpack.c.bf16 %v572_v8, %v570_v7 }
 0x10a   : > { %v585_v13 = vpack.c.bf16 %v573_v10, %v571_v9  ;;  %v547_v14 = vpop.f32.mrb[8].mxu0  ;;  %v640_v10 = vpop.permute.xlu1 %639 }
 0x10b   : > { %v548_v15 = vadd.f32 %v547_v14, %v431_v12  ;;  %v549_v16 = vpop.f32.mrb[9].mxu0 }
 0x10c   : > { %v550_v18 = vadd.f32 %v549_v16, %v431_v12  ;;  %v551_v19 = vpop.f32.mrb[10].mxu0  ;;  %769 = vmatprep.subr.bf16.mxu1 %v585_v13 }
 0x10d   : > { %v552_v20 = vadd.f32 %v551_v19, %v436_v17  ;;  %v553_v21 = vpop.f32.mrb[11].mxu0  ;;  %770 = vmatpush1.bf16.msra.mxu1 %v584_v11  ;;  %v574_v23 = vmax.f32 %v548_v15, 0.0 }
 0x10e   : > { %v554_v22 = vadd.f32 %v553_v21, %v436_v17  ;;  %v575_v25 = vmax.f32 %v550_v18, 0.0  ;;  %v645_v21 = vpop.permute.xlu0 %644 }
 0x10f   : > { %v576_v24 = vmax.f32 %v552_v20, 0.0 }
 0x110   : > { %v577_v26 = vmax.f32 %v554_v22, 0.0 }
 0x111   : > { %v586_v27 = vpack.c.bf16 %v576_v24, %v574_v23 }
 0x112   : > { %v587_v29 = vpack.c.bf16 %v577_v26, %v575_v25  ;;  %v557_v30 = vpop.f32.mrb[12].mxu0  ;;  %v650_v26 = vpop.permute.xlu1 %649 }
 0x113   : > { %v558_v31 = vadd.f32 %v557_v30, %v441_v28  ;;  %v559_v32 = vpop.f32.mrb[13].mxu0 }
 0x114   : > { %v560_v34 = vadd.f32 %v559_v32, %v441_v28  ;;  %v561_v35 = vpop.f32.mrb[14].mxu0  ;;  %771 = vmatprep.subr.bf16.mxu1 %v587_v29 }
 0x115   : > { %v562_v36 = vadd.f32 %v561_v35, %v446_v33  ;;  %v563_v37 = vpop.f32.mrb[15].mxu0  ;;  %772 = vmatpush1.bf16.msra.mxu1 %v586_v27  ;;  %v578_v39 = vmax.f32 %v558_v31, 0.0 }
 0x116   : > { %v564_v38 = vadd.f32 %v563_v37, %v446_v33  ;;  %v579_v41 = vmax.f32 %v560_v34, 0.0  ;;  %v655_v37 = vpop.permute.xlu0 %654 }
 0x117   : > { %v580_v40 = vmax.f32 %v562_v36, 0.0 }
 0x118   : > { %v581_v42 = vmax.f32 %v564_v38, 0.0 }
 0x119   : > { %v588_v43 = vpack.c.bf16 %v580_v40, %v578_v39 }
 0x11a   : > { %v589_v44 = vpack.c.bf16 %v581_v42, %v579_v41  ;;  %v660_v42 = vpop.permute.xlu1 %659 }
 0x11c   : > { %773 = vmatprep.subr.bf16.mxu1 %v589_v44 }
 0x11d   : > { %774 = vmatpush1.bf16.msra.mxu1 %v588_v43 }
 0x120   : > { %2179 = vmatmul.mubr.msk.bf16.vlgmr.msra.gmra.mrb[0].mxu1 %vm742_vm2, %v2286_v45 }
 0x121   : > { %809 = vmatprep.mubr.bf16.mxu1 %v2378_v3 }
 0x128   : > { %2180 = vmatmul.mubr.msk.bf16.gmra.mrb[4].mxu1 %vm742_vm2, %v2287_v46 }
 0x129   : > { %819 = vmatprep.mubr.bf16.mxu1 %v2378_v3 }
 0x130   : > { %2181 = vmatmul.mubr.msk.bf16.gmra.mrb[8].mxu1 %vm742_vm2, %v2288_v47 }
 0x131   : > { %829 = vmatprep.mubr.bf16.mxu1 %v2378_v3 }
 0x138   : > { %2182 = vmatmul.mubr.msk.bf16.gmra.mrb[12].mxu1 %vm742_vm2, %v2289_v48 }
 0x139   : > { %839 = vmatprep.mubr.bf16.mxu1 %v2378_v3 }
 0x140   : > { %2183 = vmatmul.mubr.msk.bf16.gmra.mrb[16].mxu1 %vm742_vm2, %v2290_v49 }
 0x141   : > { %849 = vmatprep.mubr.bf16.mxu1 %v2378_v3 }
 0x148   : > { %2184 = vmatmul.mubr.msk.bf16.gmra.mrb[20].mxu1 %vm742_vm2, %v2291_v50 }
 0x149   : > { %859 = vmatprep.mubr.bf16.mxu1 %v2378_v3 }
 0x150   : > { %2185 = vmatmul.mubr.msk.bf16.gmra.mrb[24].mxu1 %vm742_vm2, %v2292_v51 }
 0x151   : > { %869 = vmatprep.mubr.bf16.mxu1 %v2378_v3 }
 0x158   : > { %2186 = vmatmul.mubr.msk.bf16.gmra.mrb[28].mxu1 %vm742_vm2, %v2293_v52 }
 0x159   : > { %1579 = vmatprep.mubr.bf16.mxu1 %v2378_v3 }
 0x1f3   : > { %v801_v54 = vpop.f32.mrb[0].mxu1 }
 0x1f4   : > { %v802_v55 = vadd.f32 %v801_v54, %v625_v53  ;;  %v803_v56 = vpop.f32.mrb[1].mxu1 }
 0x1f5   : > { %v804_v58 = vadd.f32 %v803_v56, %v625_v53  ;;  %v805_v59 = vpop.f32.mrb[2].mxu1  ;;  %v665_v53 = vpop.permute.xlu0 %664 }
 0x1f6   : > { %v806_v60 = vadd.f32 %v805_v59, %v630_v57  ;;  %v807_v61 = vpop.f32.mrb[3].mxu1  ;;  %v880_v63 = vmax.f32 %v802_v55, 0.0 }
 0x1f7   : > { %v808_v62 = vadd.f32 %v807_v61, %v630_v57  ;;  %v881_v1 = vmax.f32 %v804_v58, 0.0  ;;  %v670_v58 = vpop.permute.xlu1 %669 }
 0x1f8   : > { %v882_v0 = vmax.f32 %v806_v60, 0.0 }
 0x1f9   : > { %v883_v2 = vmax.f32 %v808_v62, 0.0 }
 0x1fa   : > { %v912_v4 = vpack.c.bf16 %v882_v0, %v880_v63 }
 0x1fb   : > { %v913_v6 = vpack.c.bf16 %v883_v2, %v881_v1  ;;  %v811_v7 = vpop.f32.mrb[4].mxu1 }
 0x1fc   : > { %v812_v8 = vadd.f32 %v811_v7, %v635_v5  ;;  %v813_v9 = vpop.f32.mrb[5].mxu1 }
 0x1fd   : > { %v814_v11 = vadd.f32 %v813_v9, %v635_v5  ;;  %v815_v12 = vpop.f32.mrb[6].mxu1  ;;  %1008 = vmatprep.subr.bf16.mxu0 %v913_v6  ;;  %v675_v6 = vpop.permute.xlu0 %674 }
 0x1fe   : > { %v816_v13 = vadd.f32 %v815_v12, %v640_v10  ;;  %v817_v14 = vpop.f32.mrb[7].mxu1  ;;  %1009 = vmatpush1.bf16.msra.mxu0 %v912_v4  ;;  %v884_v16 = vmax.f32 %v812_v8, 0.0 }
 0x1ff   : > { %v818_v15 = vadd.f32 %v817_v14, %v640_v10  ;;  %v885_v18 = vmax.f32 %v814_v11, 0.0  ;;  %v680_v11 = vpop.permute.xlu1 %679 }
 0x200   : > { %v886_v17 = vmax.f32 %v816_v13, 0.0 }
 0x201   : > { %v887_v19 = vmax.f32 %v818_v15, 0.0 }
 0x202   : > { %v914_v20 = vpack.c.bf16 %v886_v17, %v884_v16 }
 0x203   : > { %v915_v22 = vpack.c.bf16 %v887_v19, %v885_v18  ;;  %v821_v23 = vpop.f32.mrb[8].mxu1 }
 0x204   : > { %v822_v24 = vadd.f32 %v821_v23, %v645_v21  ;;  %v823_v25 = vpop.f32.mrb[9].mxu1 }
 0x205   : > { %v824_v27 = vadd.f32 %v823_v25, %v645_v21  ;;  %v825_v28 = vpop.f32.mrb[10].mxu1  ;;  %1010 = vmatprep.subr.bf16.mxu0 %v915_v22  ;;  %v685_v22 = vpop.permute.xlu0 %684 }
 0x206   : > { %v826_v29 = vadd.f32 %v825_v28, %v650_v26  ;;  %v827_v30 = vpop.f32.mrb[11].mxu1  ;;  %1011 = vmatpush1.bf16.msra.mxu0 %v914_v20  ;;  %v888_v32 = vmax.f32 %v822_v24, 0.0 }
 0x207   : > { %v828_v31 = vadd.f32 %v827_v30, %v650_v26  ;;  %v889_v34 = vmax.f32 %v824_v27, 0.0  ;;  %v690_v27 = vpop.permute.xlu1 %689 }
 0x208   : > { %v890_v33 = vmax.f32 %v826_v29, 0.0 }
 0x209   : > { %v891_v35 = vmax.f32 %v828_v31, 0.0 }
 0x20a   : > { %v916_v36 = vpack.c.bf16 %v890_v33, %v888_v32 }
 0x20b   : > { %v917_v38 = vpack.c.bf16 %v891_v35, %v889_v34  ;;  %v831_v39 = vpop.f32.mrb[12].mxu1 }
 0x20c   : > { %v832_v40 = vadd.f32 %v831_v39, %v655_v37  ;;  %v833_v41 = vpop.f32.mrb[13].mxu1 }
 0x20d   : > { %v834_v43 = vadd.f32 %v833_v41, %v655_v37  ;;  %v835_v44 = vpop.f32.mrb[14].mxu1  ;;  %1012 = vmatprep.subr.bf16.mxu0 %v917_v38  ;;  %v695_v38 = vpop.permute.xlu0 %694 }
 0x20e   : > { %v836_v45 = vadd.f32 %v835_v44, %v660_v42  ;;  %v837_v46 = vpop.f32.mrb[15].mxu1  ;;  %1013 = vmatpush1.bf16.msra.mxu0 %v916_v36  ;;  %v892_v48 = vmax.f32 %v832_v40, 0.0 }
 0x20f   : > { %v838_v47 = vadd.f32 %v837_v46, %v660_v42  ;;  %v893_v50 = vmax.f32 %v834_v43, 0.0  ;;  %v700_v43 = vpop.permute.xlu1 %699 }
 0x210   : > { %v894_v49 = vmax.f32 %v836_v45, 0.0 }
 0x211   : > { %v895_v51 = vmax.f32 %v838_v47, 0.0 }
 0x212   : > { %v918_v52 = vpack.c.bf16 %v894_v49, %v892_v48 }
 0x213   : > { %v919_v54 = vpack.c.bf16 %v895_v51, %v893_v50  ;;  %v841_v55 = vpop.f32.mrb[16].mxu1 }
 0x214   : > { %v842_v56 = vadd.f32 %v841_v55, %v665_v53  ;;  %v843_v57 = vpop.f32.mrb[17].mxu1  ;;  %v2294_v55 = vld [vmem:[%s3274_s5] sm:$0xff]  }
 0x215   : > { %v844_v59 = vadd.f32 %v843_v57, %v665_v53  ;;  %v845_v60 = vpop.f32.mrb[18].mxu1  ;;  %1014 = vmatprep.subr.bf16.mxu0 %v919_v54  ;;  %v2296_v57 = vld [vmem:[%s3274_s5 + $0x10] sm:$0xff]  }
 0x216   : > { %v846_v61 = vadd.f32 %v845_v60, %v670_v58  ;;  %v847_v62 = vpop.f32.mrb[19].mxu1  ;;  %1015 = vmatpush1.bf16.msra.mxu0 %v918_v52  ;;  %v896_v0 = vmax.f32 %v842_v56, 0.0  ;;  %v2295_v56 = vld [vmem:[%s3274_s5 + $0x8] sm:$0xff]  }
 0x217   : > { %v848_v63 = vadd.f32 %v847_v62, %v670_v58  ;;  %v897_v2 = vmax.f32 %v844_v59, 0.0  ;;  %v2297_v58 = vld [vmem:[%s3274_s5 + $0x18] sm:$0xff]   ;;  %v947_v59 = vpop.permute.xlu0 %946 }
 0x218   : > { %v898_v1 = vmax.f32 %v846_v61, 0.0 }
 0x219   : > { %v899_v4 = vmax.f32 %v848_v63, 0.0  ;;  %v952_v63 = vpop.permute.xlu1 %951 }
 0x21a   : > { %v920_v5 = vpack.c.bf16 %v898_v1, %v896_v0 }
 0x21b   : > { %v921_v7 = vpack.c.bf16 %v899_v4, %v897_v2  ;;  %v851_v8 = vpop.f32.mrb[20].mxu1 }
 0x21c   : > { %v852_v9 = vadd.f32 %v851_v8, %v675_v6  ;;  %v853_v10 = vpop.f32.mrb[21].mxu1 }
 0x21d   : > { %v854_v12 = vadd.f32 %v853_v10, %v675_v6  ;;  %v855_v13 = vpop.f32.mrb[22].mxu1  ;;  %1016 = vmatprep.subr.bf16.mxu0 %v921_v7 }
 0x21e   : > { %v856_v14 = vadd.f32 %v855_v13, %v680_v11  ;;  %v857_v15 = vpop.f32.mrb[23].mxu1  ;;  %1017 = vmatpush1.bf16.msra.mxu0 %v920_v5  ;;  %v900_v17 = vmax.f32 %v852_v9, 0.0 }
 0x21f   : > { %v858_v16 = vadd.f32 %v857_v15, %v680_v11  ;;  %v901_v19 = vmax.f32 %v854_v12, 0.0  ;;  %v957_v11 = vpop.permute.xlu0 %956 }
 0x220   : > { %v902_v18 = vmax.f32 %v856_v14, 0.0 }
 0x221   : > { %v903_v20 = vmax.f32 %v858_v16, 0.0  ;;  %v962_v16 = vpop.permute.xlu1 %961 }
 0x222   : > { %v922_v21 = vpack.c.bf16 %v902_v18, %v900_v17 }
 0x223   : > { %v923_v23 = vpack.c.bf16 %v903_v20, %v901_v19  ;;  %v861_v24 = vpop.f32.mrb[24].mxu1 }
 0x224   : > { %v862_v25 = vadd.f32 %v861_v24, %v685_v22  ;;  %v863_v26 = vpop.f32.mrb[25].mxu1 }
 0x225   : > { %v864_v28 = vadd.f32 %v863_v26, %v685_v22  ;;  %v865_v29 = vpop.f32.mrb[26].mxu1  ;;  %1018 = vmatprep.subr.bf16.mxu0 %v923_v23 }
 0x226   : > { %v866_v30 = vadd.f32 %v865_v29, %v690_v27  ;;  %v867_v31 = vpop.f32.mrb[27].mxu1  ;;  %1019 = vmatpush1.bf16.msra.mxu0 %v922_v21  ;;  %v904_v33 = vmax.f32 %v862_v25, 0.0 }
 0x227   : > { %v868_v32 = vadd.f32 %v867_v31, %v690_v27  ;;  %v905_v35 = vmax.f32 %v864_v28, 0.0  ;;  %v967_v27 = vpop.permute.xlu0 %966 }
 0x228   : > { %v906_v34 = vmax.f32 %v866_v30, 0.0 }
 0x229   : > { %v907_v36 = vmax.f32 %v868_v32, 0.0  ;;  %v972_v32 = vpop.permute.xlu1 %971 }
 0x22a   : > { %v924_v37 = vpack.c.bf16 %v906_v34, %v904_v33 }
 0x22b   : > { %v925_v39 = vpack.c.bf16 %v907_v36, %v905_v35  ;;  %v871_v40 = vpop.f32.mrb[28].mxu1 }
 0x22c   : > { %v872_v41 = vadd.f32 %v871_v40, %v695_v38  ;;  %v873_v42 = vpop.f32.mrb[29].mxu1 }
 0x22d   : > { %v874_v44 = vadd.f32 %v873_v42, %v695_v38  ;;  %v875_v45 = vpop.f32.mrb[30].mxu1  ;;  %1020 = vmatprep.subr.bf16.mxu0 %v925_v39 }
 0x22e   : > { %v876_v46 = vadd.f32 %v875_v45, %v700_v43  ;;  %v877_v47 = vpop.f32.mrb[31].mxu1  ;;  %1021 = vmatpush1.bf16.msra.mxu0 %v924_v37  ;;  %v908_v49 = vmax.f32 %v872_v41, 0.0 }
 0x22f   : > { %v878_v48 = vadd.f32 %v877_v47, %v700_v43  ;;  %v909_v51 = vmax.f32 %v874_v44, 0.0  ;;  %v977_v43 = vpop.permute.xlu0 %976 }
 0x230   : > { %v910_v50 = vmax.f32 %v876_v46, 0.0 }
 0x231   : > { %v911_v52 = vmax.f32 %v878_v48, 0.0  ;;  %v982_v48 = vpop.permute.xlu1 %981 }
 0x232   : > { %v926_v53 = vpack.c.bf16 %v910_v50, %v908_v49 }
 0x233   : > { %v927_v54 = vpack.c.bf16 %v911_v52, %v909_v51 }
 0x235   : > { %1022 = vmatprep.subr.bf16.mxu0 %v927_v54 }
 0x236   : > { %1023 = vmatpush1.bf16.msra.mxu0 %v926_v53 }
 0x239   : > { %1041 = vmatmul.mubr.bf16.vlgmr.msra.gmra.mrb[16].mxu0 %v2294_v55 }
 0x23a   : > { %1050 = vmatprep.mubr.bf16.mxu0 %v2378_v3 }
 0x241   : > { %1051 = vmatmul.mubr.bf16.gmra.mrb[20].mxu0 %v2295_v56 }
 0x242   : > { %1060 = vmatprep.mubr.bf16.mxu0 %v2378_v3 }
 0x249   : > { %1061 = vmatmul.mubr.bf16.gmra.mrb[24].mxu0 %v2296_v57 }
 0x24a   : > { %1070 = vmatprep.mubr.bf16.mxu0 %v2378_v3 }
 0x251   : > { %1071 = vmatmul.mubr.bf16.gmra.mrb[28].mxu0 %v2297_v58 }
 0x252   : > { %1489 = vmatprep.mubr.bf16.mxu0 %v2378_v3 }
 0x30c   : > { %v1042_v60 = vpop.f32.mrb[16].mxu0 }
 0x30d   : > { %v1043_v61 = vadd.f32 %v1042_v60, %v947_v59  ;;  %v1044_v62 = vpop.f32.mrb[17].mxu0  ;;  %v2298_v60 = vld [vmem:[%s3276_s7] sm:$0xff]  }
 0x30e   : > { %v1045_v0 = vadd.f32 %v1044_v62, %v947_v59  ;;  %v1046_v1 = vpop.f32.mrb[18].mxu0  ;;  %v2300_v62 = vld [vmem:[%s3276_s7 + $0x8] sm:$0xff]  }
 0x30f   : > { %v1047_v2 = vadd.f32 %v1046_v1, %v952_v63  ;;  %v1048_v4 = vpop.f32.mrb[19].mxu0  ;;  %v1081_v6 = vmax.f32 %v1043_v61, 0.0  ;;  %v2299_v61 = vld [vmem:[%s3276_s7 + $0x48] sm:$0xff]   ;;  %v2303_v1 = vld [vmem:[%s3276_s7 + $0x58] sm:$0xff]  }
 0x310   : > { %v1049_v5 = vadd.f32 %v1048_v4, %v952_v63  ;;  %v1082_v8 = vmax.f32 %v1045_v0, 0.0  ;;  %v2301_v63 = vld [vmem:[%s3276_s7 + $0x50] sm:$0xff]   ;;  %v2305_v4 = vld [vmem:[%s3276_s7 + $0x60] sm:$0xff]  }
 0x311   : > { %v1083_v7 = vmax.f32 %v1047_v2, 0.0  ;;  %v2302_v0 = vld [vmem:[%s3276_s7 + $0x10] sm:$0xff]   ;;  %v2304_v2 = vld [vmem:[%s3276_s7 + $0x18] sm:$0xff]  }
 0x312   : > { %v1084_v9 = vmax.f32 %v1049_v5, 0.0  ;;  %v2306_v5 = vld [vmem:[%s3276_s7 + $0x20] sm:$0xff]  }
 0x313   : > { %v1097_v10 = vpack.c.bf16 %v1083_v7, %v1081_v6  ;;  %v2307_v6 = vld [vmem:[%s3276_s7 + $0x68] sm:$0xff]  }
 0x314   : > { %v1098_v12 = vpack.c.bf16 %v1084_v9, %v1082_v8  ;;  %v1052_v13 = vpop.f32.mrb[20].mxu0  ;;  %v2308_v7 = vld [vmem:[%s3276_s7 + $0x28] sm:$0xff]   ;;  %v2309_v8 = vld [vmem:[%s3276_s7 + $0x70] sm:$0xff]  }
 0x315   : > { %v1053_v14 = vadd.f32 %v1052_v13, %v957_v11  ;;  %v1054_v15 = vpop.f32.mrb[21].mxu0  ;;  %v2310_v9 = vld [vmem:[%s3276_s7 + $0x30] sm:$0xff]   ;;  %v1177_v13 = vpop.permute.xlu1 %1176 }
 0x316   : > { %v1055_v17 = vadd.f32 %v1054_v15, %v957_v11  ;;  %v1056_v18 = vpop.f32.mrb[22].mxu0  ;;  %1457 = vmatprep.subr.bf16.mxu0 %v1098_v12  ;;  %2229 = vmatprep.subr.bf16.mxu1 %v1098_v12  ;;  %v2312_v11 = vld [vmem:[%s3276_s7 + $0x38] sm:$0xff]   ;;  %v2313_v12 = vld [vmem:[%s3276_s7 + $0x40] sm:$0xff]  }
 0x317   : > { %v1057_v19 = vadd.f32 %v1056_v18, %v962_v16  ;;  %v1058_v20 = vpop.f32.mrb[23].mxu0  ;;  %1458 = vmatpush1.bf16.msra.mxu0 %v1097_v10  ;;  %2233 = vmatpush1.bf16.msra.mxu1 %v1097_v10  ;;  %v1085_v22 = vmax.f32 %v1053_v14, 0.0  ;;  %v2311_v10 = vld [vmem:[%s3276_s7 + $0x78] sm:$0xff]   ;;  %v1172_v14 = vpop.permute.xlu0 %1171 }
 0x318   : > { %v1059_v21 = vadd.f32 %v1058_v20, %v962_v16  ;;  %v1086_v24 = vmax.f32 %v1055_v17, 0.0 }
 0x319   : > { %v1087_v23 = vmax.f32 %v1057_v19, 0.0  ;;  %v2942_v15 = vpop.permute.xlu1 %1186 }
 0x31a   : > { %v1088_v25 = vmax.f32 %v1059_v21, 0.0 }
 0x31b   : > { %v1099_v26 = vpack.c.bf16 %v1087_v23, %v1085_v22  ;;  %v1182_v16 = vpop.permute.xlu0 %1181 }
 0x31c   : > { %v1100_v28 = vpack.c.bf16 %v1088_v25, %v1086_v24  ;;  %v1062_v29 = vpop.f32.mrb[24].mxu0 }
 0x31d   : > { %v1063_v30 = vadd.f32 %v1062_v29, %v967_v27  ;;  %v1064_v31 = vpop.f32.mrb[25].mxu0  ;;  %v2944_v17 = vpop.permute.xlu1 %1196 }
 0x31e   : > { %v1065_v33 = vadd.f32 %v1064_v31, %v967_v27  ;;  %v1066_v34 = vpop.f32.mrb[26].mxu0  ;;  %1459 = vmatprep.subr.bf16.mxu0 %v1100_v28  ;;  %2230 = vmatprep.subr.bf16.mxu1 %v1100_v28 }
 0x31f   : > { %v1067_v35 = vadd.f32 %v1066_v34, %v972_v32  ;;  %v1068_v36 = vpop.f32.mrb[27].mxu0  ;;  %1460 = vmatpush1.bf16.msra.mxu0 %v1099_v26  ;;  %2234 = vmatpush1.bf16.msra.mxu1 %v1099_v26  ;;  %v1089_v38 = vmax.f32 %v1063_v30, 0.0  ;;  %v2946_v18 = vpop.permute.xlu0 %1191 }
 0x320   : > { %v1069_v37 = vadd.f32 %v1068_v36, %v972_v32  ;;  %v1090_v40 = vmax.f32 %v1065_v33, 0.0 }
 0x321   : > { %v1091_v39 = vmax.f32 %v1067_v35, 0.0  ;;  %v2948_v19 = vpop.permute.xlu1 %1206 }
 0x322   : > { %v1092_v41 = vmax.f32 %v1069_v37, 0.0 }
 0x323   : > { %v1101_v42 = vpack.c.bf16 %v1091_v39, %v1089_v38  ;;  %v2950_v20 = vpop.permute.xlu0 %1201 }
 0x324   : > { %v1102_v44 = vpack.c.bf16 %v1092_v41, %v1090_v40  ;;  %v1072_v45 = vpop.f32.mrb[28].mxu0 }
 0x325   : > { %v1073_v46 = vadd.f32 %v1072_v45, %v977_v43  ;;  %v1074_v47 = vpop.f32.mrb[29].mxu0 }
 0x326   : > { %v1075_v49 = vadd.f32 %v1074_v47, %v977_v43  ;;  %v1076_v50 = vpop.f32.mrb[30].mxu0  ;;  %1461 = vmatprep.subr.bf16.mxu0 %v1102_v44  ;;  %2231 = vmatprep.subr.bf16.mxu1 %v1102_v44 }
 0x327   : > { %v1077_v51 = vadd.f32 %v1076_v50, %v982_v48  ;;  %v1078_v52 = vpop.f32.mrb[31].mxu0  ;;  %1462 = vmatpush1.bf16.msra.mxu0 %v1101_v42  ;;  %2235 = vmatpush1.bf16.msra.mxu1 %v1101_v42  ;;  %v1093_v54 = vmax.f32 %v1073_v46, 0.0  ;;  %v2954_v21 = vpop.permute.xlu0 %1211 }
 0x328   : > { %v1079_v53 = vadd.f32 %v1078_v52, %v982_v48  ;;  %v1094_v56 = vmax.f32 %v1075_v49, 0.0 }
 0x329   : > { %v1095_v55 = vmax.f32 %v1077_v51, 0.0 }
 0x32a   : > { %v1096_v57 = vmax.f32 %v1079_v53, 0.0 }
 0x32b   : > { %v1103_v58 = vpack.c.bf16 %v1095_v55, %v1093_v54  ;;  %v2958_v23 = vpop.permute.xlu0 %1221 }
 0x32c   : > { %v1104_v59 = vpack.c.bf16 %v1096_v57, %v1094_v56 }
 0x32e   : > { %1463 = vmatprep.subr.bf16.mxu0 %v1104_v59  ;;  %2232 = vmatprep.subr.bf16.mxu1 %v1104_v59 }
 0x32f   : > { %1464 = vmatpush1.bf16.msra.mxu0 %v1103_v58  ;;  %2236 = vmatpush1.bf16.msra.mxu1 %v1103_v58  ;;  %v2962_v25 = vpop.permute.xlu0 %1231 }
 0x332   : > { %2207 = vmatmul.mubr.msk.bf16.vlgmr.msra.gmra.mrb[32].mxu0 %vm742_vm2, %v2298_v60  ;;  %2216 = vmatmul.mubr.msk.bf16.vlgmr.msra.gmra.mrb[32].mxu1 %vm742_vm2, %v2299_v61 }
 0x333   : > { %1499 = vmatprep.mubr.bf16.mxu0 %v2378_v3  ;;  %1589 = vmatprep.mubr.bf16.mxu1 %v2378_v3  ;;  %v2966_v27 = vpop.permute.xlu0 %1241 }
 0x337   : > { %v2970_v29 = vpop.permute.xlu0 %1251 }
 0x33a   : > { %2208 = vmatmul.mubr.msk.bf16.gmra.mrb[36].mxu0 %vm742_vm2, %v2300_v62  ;;  %2217 = vmatmul.mubr.msk.bf16.gmra.mrb[36].mxu1 %vm742_vm2, %v2301_v63 }
 0x33b   : > { %1509 = vmatprep.mubr.bf16.mxu0 %v2378_v3  ;;  %1599 = vmatprep.mubr.bf16.mxu1 %v2378_v3  ;;  %v2974_v31 = vpop.permute.xlu0 %1261 }
 0x33f   : > { %v2978_v33 = vpop.permute.xlu0 %1271 }
 0x342   : > { %2209 = vmatmul.mubr.msk.bf16.gmra.mrb[40].mxu0 %vm742_vm2, %v2302_v0  ;;  %2218 = vmatmul.mubr.msk.bf16.gmra.mrb[40].mxu1 %vm742_vm2, %v2303_v1 }
 0x343   : > { %1519 = vmatprep.mubr.bf16.mxu0 %v2378_v3  ;;  %1609 = vmatprep.mubr.bf16.mxu1 %v2378_v3  ;;  %v2982_v35 = vpop.permute.xlu0 %1281 }
 0x347   : > { %v2986_v37 = vpop.permute.xlu0 %1291 }
 0x34a   : > { %2210 = vmatmul.mubr.msk.bf16.gmra.mrb[44].mxu0 %vm742_vm2, %v2304_v2  ;;  %2219 = vmatmul.mubr.msk.bf16.gmra.mrb[44].mxu1 %vm742_vm2, %v2305_v4 }
 0x34b   : > { %1529 = vmatprep.mubr.bf16.mxu0 %v2378_v3  ;;  %1619 = vmatprep.mubr.bf16.mxu1 %v2378_v3  ;;  %v2990_v39 = vpop.permute.xlu0 %1301 }
 0x34f   : > { %v1749_v41 = vpop.permute.xlu0 %1748 }
 0x352   : > { %2211 = vmatmul.mubr.msk.bf16.gmra.mrb[48].mxu0 %vm742_vm2, %v2306_v5  ;;  %2220 = vmatmul.mubr.msk.bf16.gmra.mrb[48].mxu1 %vm742_vm2, %v2307_v6 }
 0x353   : > { %1539 = vmatprep.mubr.bf16.mxu0 %v2378_v3  ;;  %1629 = vmatprep.mubr.bf16.mxu1 %v2378_v3  ;;  %v1759_v43 = vpop.permute.xlu0 %1758 }
 0x357   : > { %v2994_v45 = vpop.permute.xlu0 %1768 }
 0x35a   : > { %2212 = vmatmul.mubr.msk.bf16.gmra.mrb[52].mxu0 %vm742_vm2, %v2308_v7  ;;  %2221 = vmatmul.mubr.msk.bf16.gmra.mrb[52].mxu1 %vm742_vm2, %v2309_v8 }
 0x35b   : > { %1549 = vmatprep.mubr.bf16.mxu0 %v2378_v3  ;;  %1639 = vmatprep.mubr.bf16.mxu1 %v2378_v3  ;;  %v2998_v47 = vpop.permute.xlu0 %1778 }
 0x35f   : > { %v3010_v1 = vpop.permute.xlu0 %1788 }
 0x362   : > { %2213 = vmatmul.mubr.msk.bf16.gmra.mrb[56].mxu0 %vm742_vm2, %v2310_v9  ;;  %2222 = vmatmul.mubr.msk.bf16.gmra.mrb[56].mxu1 %vm742_vm2, %v2311_v10 }
 0x363   : > { %1559 = vmatprep.mubr.bf16.mxu0 %v2378_v3 }
 0x36a   : > { %2214 = vmatmul.mubr.msk.bf16.gmra.mrb[60].mxu0 %vm742_vm2, %v2312_v11 }
 0x36b   : > { %1569 = vmatprep.mubr.bf16.mxu0 %v2378_v3  ;;  %v2952_v3 = vpop.permute.xlu1 %1216 }
 0x36f   : > { %v2956_v22 = vpop.permute.xlu1 %1226 }
 0x372   : > { %2215 = vmatmul.mubr.msk.bf16.gmra.mrb[64].mxu0 %vm742_vm2, %v2313_v12 }
 0x373   : > { %v2960_v24 = vpop.permute.xlu1 %1236 }
 0x377   : > { %v2964_v26 = vpop.permute.xlu1 %1246 }
 0x37b   : > { %v2968_v28 = vpop.permute.xlu1 %1256 }
 0x37f   : > { %v2972_v30 = vpop.permute.xlu1 %1266 }
 0x383   : > { %v2976_v32 = vpop.permute.xlu1 %1276 }
 0x387   : > { %v2980_v34 = vpop.permute.xlu1 %1286 }
 0x38b   : > { %v2984_v36 = vpop.permute.xlu1 %1296 }
 0x38f   : > { %v2988_v38 = vpop.permute.xlu1 %1306 }
 0x390   : > { %3284 = vst [vmem:[#allocation6_spill] sm:$0xff] %v2988_v38 }
 0x393   : > { %v1754_v40 = vpop.permute.xlu1 %1753 }
 0x397   : > { %v1764_v42 = vpop.permute.xlu1 %1763 }
 0x39b   : > { %v2992_v44 = vpop.permute.xlu1 %1773 }
 0x39f   : > { %v2996_v46 = vpop.permute.xlu1 %1783 }
 0x3a3   : > { %v3008_v0 = vpop.permute.xlu1 %1793 }
 0x405   : > { %v1491_v48 = vpop.f32.mrb[32].mxu0  ;;  %v3000_v49 = vpop.f32.mrb[32].mxu1 }
 0x406   : > { %v1492_v50 = vadd.f32 %v1491_v48, %v1172_v14  ;;  %v1493_v51 = vpop.f32.mrb[33].mxu0  ;;  %v3002_v52 = vpop.f32.mrb[33].mxu1 }
 0x407   : > { %v1494_v53 = vadd.f32 %v1493_v51, %v1172_v14  ;;  %v1495_v54 = vpop.f32.mrb[34].mxu0  ;;  %v3004_v55 = vpop.f32.mrb[34].mxu1 }
 0x408   : > { %v1650_v56 = vmax.f32 %v1492_v50, 0.0  ;;  %v1496_v57 = vadd.f32 %v1495_v54, %v1177_v13  ;;  %v1497_v58 = vpop.f32.mrb[35].mxu0  ;;  %v3006_v59 = vpop.f32.mrb[35].mxu1 }
 0x409   : > { %v1651_v60 = vmax.f32 %v1494_v53, 0.0  ;;  %v1498_v61 = vadd.f32 %v1497_v58, %v1177_v13 }
 0x40a   : > { %v1652_v62 = vmax.f32 %v1496_v57, 0.0  ;;  %v1906_v2 = vmul.f32 %v1749_v41, %v1650_v56 }
 0x40b   : > { %v1653_v63 = vmax.f32 %v1498_v61, 0.0  ;;  %v1907_v5 = vmul.f32 %v1749_v41, %v1651_v60 }
 0x40c   : > { %v1908_v4 = vmul.f32 %v1754_v40, %v1652_v62  ;;  %v3022_v62 = vpop.permute.xlu1 %1803 }
 0x40d   : > { %v1909_v6 = vmul.f32 %v1754_v40, %v1653_v63  ;;  %v1501_v7 = vpop.f32.mrb[36].mxu0  ;;  %v3012_v8 = vpop.f32.mrb[36].mxu1 }
 0x40e   : > { %v1970_v9 = vadd.f32 %v1908_v4, %v1906_v2  ;;  %v1502_v10 = vadd.f32 %v1501_v7, %v1182_v16  ;;  %v1503_v11 = vpop.f32.mrb[37].mxu0  ;;  %v3014_v12 = vpop.f32.mrb[37].mxu1 }
 0x40f   : > { %v2007_v14 = vadd.f32 %v1909_v6, %v1907_v5  ;;  %v1504_v13 = vadd.f32 %v1503_v11, %v1182_v16  ;;  %v1505_v48 = vpop.f32.mrb[38].mxu0  ;;  %v3016_v50 = vpop.f32.mrb[38].mxu1 }
 0x410   : > { %v1654_v51 = vmax.f32 %v1502_v10, 0.0  ;;  %v1506_v53 = vadd.f32 %v1505_v48, %v2942_v15  ;;  %v1507_v54 = vpop.f32.mrb[39].mxu0  ;;  %v3019_v56 = vpop.f32.mrb[39].mxu1 }
 0x411   : > { %v1655_v40 = vmax.f32 %v1504_v13, 0.0  ;;  %v1508_v41 = vadd.f32 %v1507_v54, %v2942_v15  ;;  %v3024_v63 = vpop.permute.xlu0 %1798 }
 0x412   : > { %v1910_v57 = vmul.f32 %v1759_v43, %v1654_v51  ;;  %v1656_v58 = vmax.f32 %v1506_v53, 0.0 }
 0x413   : > { %v1911_v60 = vmul.f32 %v1759_v43, %v1655_v40  ;;  %v1657_v61 = vmax.f32 %v1508_v41, 0.0 }
 0x414   : > { %v1971_v16 = vadd.f32 %v1970_v9, %v1910_v57  ;;  %v1912_v2 = vmul.f32 %v1764_v42, %v1656_v58 }
 0x415   : > { %v2008_v4 = vadd.f32 %v2007_v14, %v1911_v60  ;;  %v1913_v5 = vmul.f32 %v1764_v42, %v1657_v61  ;;  %v1511_v6 = vpop.f32.mrb[40].mxu0  ;;  %v3026_v7 = vpop.f32.mrb[40].mxu1 }
 0x416   : > { %v1972_v10 = vadd.f32 %v1971_v16, %v1912_v2  ;;  %v1512_v11 = vadd.f32 %v1511_v6, %v2946_v18  ;;  %v1513_v13 = vpop.f32.mrb[41].mxu0  ;;  %v3029_v15 = vpop.f32.mrb[41].mxu1 }
 0x417   : > { %v2009_v48 = vadd.f32 %v2008_v4, %v1913_v5  ;;  %v1514_v43 = vadd.f32 %v1513_v13, %v2946_v18  ;;  %v1515_v51 = vpop.f32.mrb[42].mxu0  ;;  %v3032_v53 = vpop.f32.mrb[42].mxu1 }
 0x418   : > { %v1658_v54 = vmax.f32 %v1512_v11, 0.0  ;;  %v1516_v9 = vadd.f32 %v1515_v51, %v2944_v17  ;;  %v1517_v14 = vpop.f32.mrb[43].mxu0  ;;  %v3035_v42 = vpop.f32.mrb[43].mxu1 }
 0x419   : > { %v1659_v40 = vmax.f32 %v1514_v43, 0.0  ;;  %v1518_v41 = vadd.f32 %v1517_v14, %v2944_v17  ;;  %v3040_v16 = vpop.permute.xlu1 %1813  ;;  %v3042_v18 = vpop.permute.xlu0 %1808 }
 0x41a   : > { %v1914_v57 = vmul.f32 %v2994_v45, %v1658_v54  ;;  %v1660_v58 = vmax.f32 %v1516_v9, 0.0 }
 0x41b   : > { %v1915_v60 = vmul.f32 %v2994_v45, %v1659_v40  ;;  %v1661_v61 = vmax.f32 %v1518_v41, 0.0 }
 0x41c   : > { %v1973_v2 = vadd.f32 %v1972_v10, %v1914_v57  ;;  %v1916_v4 = vmul.f32 %v2992_v44, %v1660_v58 }
 0x41d   : > { %v2010_v5 = vadd.f32 %v2009_v48, %v1915_v60  ;;  %v1917_v6 = vmul.f32 %v2992_v44, %v1661_v61  ;;  %v1521_v11 = vpop.f32.mrb[44].mxu0  ;;  %v3046_v13 = vpop.f32.mrb[44].mxu1 }
 0x41e   : > { %v1974_v17 = vadd.f32 %v1973_v2, %v1916_v4  ;;  %v1522_v43 = vadd.f32 %v1521_v11, %v2950_v20  ;;  %v1523_v51 = vpop.f32.mrb[45].mxu0  ;;  %v3049_v54 = vpop.f32.mrb[45].mxu1 }
 0x41f   : > { %v2011_v45 = vadd.f32 %v2010_v5, %v1917_v6  ;;  %v1524_v9 = vadd.f32 %v1523_v51, %v2950_v20  ;;  %v1525_v14 = vpop.f32.mrb[46].mxu0  ;;  %v3052_v40 = vpop.f32.mrb[46].mxu1 }
 0x420   : > { %v1662_v10 = vmax.f32 %v1522_v43, 0.0  ;;  %v1526_v48 = vadd.f32 %v1525_v14, %v2948_v19  ;;  %v1527_v41 = vpop.f32.mrb[47].mxu0  ;;  %v3055_v44 = vpop.f32.mrb[47].mxu1 }
 0x421   : > { %v1663_v57 = vmax.f32 %v1524_v9, 0.0  ;;  %v1528_v58 = vadd.f32 %v1527_v41, %v2948_v19  ;;  %v3060_v5 = vpop.permute.xlu1 %1823  ;;  %v3062_v20 = vpop.permute.xlu0 %1818 }
 0x422   : > { %v1918_v60 = vmul.f32 %v2998_v47, %v1662_v10  ;;  %v1664_v61 = vmax.f32 %v1526_v48, 0.0 }
 0x423   : > { %v1919_v2 = vmul.f32 %v2998_v47, %v1663_v57  ;;  %v1665_v4 = vmax.f32 %v1528_v58, 0.0 }
 0x424   : > { %v1975_v6 = vadd.f32 %v1974_v17, %v1918_v60  ;;  %v1920_v11 = vmul.f32 %v2996_v46, %v1664_v61 }
 0x425   : > { %v2012_v43 = vadd.f32 %v2011_v45, %v1919_v2  ;;  %v1921_v51 = vmul.f32 %v2996_v46, %v1665_v4  ;;  %v1531_v14 = vpop.f32.mrb[48].mxu0  ;;  %v3066_v9 = vpop.f32.mrb[48].mxu1 }
 0x426   : > { %v1976_v19 = vadd.f32 %v1975_v6, %v1920_v11  ;;  %v1532_v10 = vadd.f32 %v1531_v14, %v2954_v21  ;;  %v1533_v48 = vpop.f32.mrb[49].mxu0  ;;  %v3069_v41 = vpop.f32.mrb[49].mxu1 }
 0x427   : > { %v2013_v47 = vadd.f32 %v2012_v43, %v1921_v51  ;;  %v1534_v57 = vadd.f32 %v1533_v48, %v2954_v21  ;;  %v1535_v58 = vpop.f32.mrb[50].mxu0  ;;  %v3072_v38 = vpop.f32.mrb[50].mxu1 }
 0x428   : > { %3285 = vst [vmem:[#allocation7_spill] sm:$0xff] %v3072_v38  ;;  %v1666_v17 = vmax.f32 %v1532_v10, 0.0  ;;  %v1536_v45 = vadd.f32 %v1535_v58, %v2952_v3  ;;  %v1537_v60 = vpop.f32.mrb[51].mxu0  ;;  %v3075_v46 = vpop.f32.mrb[51].mxu1 }
 0x429   : > { %3286 = vst [vmem:[#allocation8_spill] sm:$0xff] %v3075_v46  ;;  %v1667_v61 = vmax.f32 %v1534_v57, 0.0  ;;  %v1538_v2 = vadd.f32 %v1537_v60, %v2952_v3  ;;  %v3080_v51 = vpop.permute.xlu1 %1833  ;;  %v3082_v21 = vpop.permute.xlu0 %1828 }
 0x42a   : > { %v1922_v4 = vmul.f32 %v3010_v1, %v1666_v17  ;;  %v1668_v6 = vmax.f32 %v1536_v45, 0.0 }
 0x42b   : > { %v1923_v11 = vmul.f32 %v3010_v1, %v1667_v61  ;;  %v1669_v43 = vmax.f32 %v1538_v2, 0.0 }
 0x42c   : > { %v1977_v14 = vadd.f32 %v1976_v19, %v1922_v4  ;;  %v1924_v10 = vmul.f32 %v3008_v0, %v1668_v6 }
 0x42d   : > { %v2014_v48 = vadd.f32 %v2013_v47, %v1923_v11  ;;  %v1925_v58 = vmul.f32 %v3008_v0, %v1669_v43  ;;  %v1541_v46 = vpop.f32.mrb[52].mxu0  ;;  %v3086_v57 = vpop.f32.mrb[52].mxu1 }
 0x42e   : > { %v1978_v3 = vadd.f32 %v1977_v14, %v1924_v10  ;;  %v1542_v17 = vadd.f32 %v1541_v46, %v2958_v23  ;;  %v1543_v45 = vpop.f32.mrb[53].mxu0  ;;  %v3089_v60 = vpop.f32.mrb[53].mxu1 }
 0x42f   : > { %v2015_v1 = vadd.f32 %v2014_v48, %v1925_v58  ;;  %v1544_v61 = vadd.f32 %v1543_v45, %v2958_v23  ;;  %v1545_v2 = vpop.f32.mrb[54].mxu0  ;;  %v3092_v38 = vpop.f32.mrb[54].mxu1 }
 0x430   : > { %3287 = vst [vmem:[#allocation9_spill] sm:$0xff] %v3092_v38  ;;  %v1670_v19 = vmax.f32 %v1542_v17, 0.0  ;;  %v1546_v47 = vadd.f32 %v1545_v2, %v2956_v22  ;;  %v1547_v4 = vpop.f32.mrb[55].mxu0  ;;  %v3095_v0 = vpop.f32.mrb[55].mxu1 }
 0x431   : > { %3288 = vst [vmem:[#allocation10_spill] sm:$0xff] %v3095_v0  ;;  %v1671_v6 = vmax.f32 %v1544_v61, 0.0  ;;  %v1548_v11 = vadd.f32 %v1547_v4, %v2956_v22  ;;  %v3100_v48 = vpop.permute.xlu1 %1843  ;;  %v3102_v23 = vpop.permute.xlu0 %1838 }
 0x432   : > { %v1926_v46 = vmul.f32 %v3024_v63, %v1670_v19  ;;  %v1672_v43 = vmax.f32 %v1546_v47, 0.0 }
 0x433   : > { %v1927_v14 = vmul.f32 %v3024_v63, %v1671_v6  ;;  %v1673_v10 = vmax.f32 %v1548_v11, 0.0 }
 0x434   : > { %v1979_v58 = vadd.f32 %v1978_v3, %v1926_v46  ;;  %v1928_v17 = vmul.f32 %v3022_v62, %v1672_v43 }
 0x435   : > { %v2016_v45 = vadd.f32 %v2015_v1, %v1927_v14  ;;  %v1929_v2 = vmul.f32 %v3022_v62, %v1673_v10  ;;  %v1551_v0 = vpop.f32.mrb[56].mxu0  ;;  %v3106_v61 = vpop.f32.mrb[56].mxu1 }
 0x436   : > { %v1980_v22 = vadd.f32 %v1979_v58, %v1928_v17  ;;  %v1552_v19 = vadd.f32 %v1551_v0, %v2962_v25  ;;  %v1553_v47 = vpop.f32.mrb[57].mxu0  ;;  %v3109_v4 = vpop.f32.mrb[57].mxu1 }
 0x437   : > { %3289 = vst [vmem:[#allocation11_spill] sm:$0xff] %v3109_v4  ;;  %v2017_v63 = vadd.f32 %v2016_v45, %v1929_v2  ;;  %v1554_v6 = vadd.f32 %v1553_v47, %v2962_v25  ;;  %v1555_v11 = vpop.f32.mrb[58].mxu0  ;;  %v3112_v38 = vpop.f32.mrb[58].mxu1 }
 0x438   : > { %3290 = vst [vmem:[#allocation12_spill] sm:$0xff] %v3112_v38  ;;  %v1674_v3 = vmax.f32 %v1552_v19, 0.0  ;;  %v1556_v1 = vadd.f32 %v1555_v11, %v2960_v24  ;;  %v1557_v46 = vpop.f32.mrb[59].mxu0  ;;  %v3115_v62 = vpop.f32.mrb[59].mxu1 }
 0x439   : > { %3291 = vst [vmem:[#allocation13_spill] sm:$0xff] %v3115_v62  ;;  %v1675_v43 = vmax.f32 %v1554_v6, 0.0  ;;  %v1558_v14 = vadd.f32 %v1557_v46, %v2960_v24  ;;  %v3119_v58 = vpop.permute.xlu0 %1848  ;;  %v3123_v19 = vpop.permute.xlu1 %1853 }
 0x43a   : > { %v1930_v0 = vmul.f32 %v3042_v18, %v1674_v3  ;;  %v1676_v10 = vmax.f32 %v1556_v1, 0.0 }
 0x43b   : > { %v1931_v17 = vmul.f32 %v3042_v18, %v1675_v43  ;;  %v1677_v25 = vmax.f32 %v1558_v14, 0.0 }
 0x43c   : > { %v1981_v45 = vadd.f32 %v1980_v22, %v1930_v0  ;;  %v1932_v2 = vmul.f32 %v3040_v16, %v1676_v10 }
 0x43d   : > { %v2018_v47 = vadd.f32 %v2017_v63, %v1931_v17  ;;  %v1933_v11 = vmul.f32 %v3040_v16, %v1677_v25  ;;  %v1561_v62 = vpop.f32.mrb[60].mxu0  ;;  %v3129_v43 = vpop.permute.xlu0 %1858 }
 0x43e   : > { %v1982_v6 = vadd.f32 %v1981_v45, %v1932_v2  ;;  %v1562_v24 = vadd.f32 %v1561_v62, %v2966_v27  ;;  %v1563_v46 = vpop.f32.mrb[61].mxu0  ;;  %v3133_v10 = vpop.permute.xlu1 %1863 }
 0x43f   : > { %v2019_v3 = vadd.f32 %v2018_v47, %v1933_v11  ;;  %v1564_v1 = vadd.f32 %v1563_v46, %v2966_v27  ;;  %v1565_v38 = vpop.f32.mrb[62].mxu0  ;;  %v1582_v47 = vadd.f32 %v3000_v49, %v2974_v31 }
 0x440   : > { %v1678_v4 = vmax.f32 %v1562_v24, 0.0  ;;  %v1566_v18 = vadd.f32 %v1565_v38, %v2964_v26  ;;  %v1567_v22 = vpop.f32.mrb[63].mxu0 }
 0x441   : > { %v1679_v14 = vmax.f32 %v1564_v1, 0.0  ;;  %v1568_v63 = vadd.f32 %v1567_v22, %v2964_v26  ;;  %v3141_v24 = vpop.permute.xlu0 %1868 }
 0x442   : > { %v1934_v16 = vmul.f32 %v3062_v20, %v1678_v4  ;;  %v1680_v0 = vmax.f32 %v1566_v18, 0.0  ;;  %v3149_v22 = vpop.permute.xlu1 %1873 }
 0x443   : > { %v1935_v62 = vmul.f32 %v3062_v20, %v1679_v14  ;;  %v1681_v17 = vmax.f32 %v1568_v63, 0.0  ;;  %v1584_v20 = vadd.f32 %v3002_v52, %v2974_v31  ;;  %v1588_v14 = vadd.f32 %v3006_v59, %v2972_v30 }
 0x444   : > { %v1983_v25 = vadd.f32 %v1982_v6, %v1934_v16  ;;  %v1936_v27 = vmul.f32 %v3060_v5, %v1680_v0  ;;  %v1686_v31 = vmax.f32 %v1582_v47, 0.0 }
 0x445   : > { %v2020_v45 = vadd.f32 %v2019_v3, %v1935_v62  ;;  %v1937_v38 = vmul.f32 %v3060_v5, %v1681_v17  ;;  %v1571_v2 = vpop.f32.mrb[64].mxu0  ;;  %v1586_v5 = vadd.f32 %v3004_v55, %v2972_v30  ;;  %v1687_v55 = vmax.f32 %v1584_v20, 0.0 }
 0x446   : > { %v1984_v11 = vadd.f32 %v1983_v25, %v1936_v27  ;;  %v1572_v26 = vadd.f32 %v1571_v2, %v2970_v29  ;;  %v1573_v4 = vpop.f32.mrb[65].mxu0  ;;  %v1594_v62 = vadd.f32 %v3014_v12, %v2978_v33  ;;  %v1596_v30 = vadd.f32 %v3016_v50, %v2976_v32  ;;  %v3171_v50 = vpop.permute.xlu1 %1878 }
 0x447   : > { %v2021_v46 = vadd.f32 %v2020_v45, %v1937_v38  ;;  %v1574_v6 = vadd.f32 %v1573_v4, %v2970_v29  ;;  %v1575_v1 = vpop.f32.mrb[66].mxu0  ;;  %v1592_v29 = vadd.f32 %v3012_v8, %v2978_v33  ;;  %v1688_v27 = vmax.f32 %v1586_v5, 0.0  ;;  %v3163_v45 = vpop.permute.xlu0 %1311 }
 0x448   : > { %v1682_v3 = vmax.f32 %v1572_v26, 0.0  ;;  %v1576_v18 = vadd.f32 %v1575_v1, %v2968_v28  ;;  %v1577_v49 = vpop.f32.mrb[67].mxu0  ;;  %v1689_v8 = vmax.f32 %v1588_v14, 0.0  ;;  %v1598_v38 = vadd.f32 %v3019_v56, %v2976_v32 }
 0x449   : > { %v1683_v63 = vmax.f32 %v1574_v6, 0.0  ;;  %v1578_v16 = vadd.f32 %v1577_v49, %v2968_v28  ;;  %v1942_v33 = vmul.f32 %v3102_v23, %v1686_v31  ;;  %v1690_v12 = vmax.f32 %v1592_v29, 0.0 }
 0x44a   : > { %v1938_v52 = vmul.f32 %v3082_v21, %v1682_v3  ;;  %v1684_v0 = vmax.f32 %v1576_v18, 0.0  ;;  %v1691_v4 = vmax.f32 %v1594_v62, 0.0  ;;  %v1604_v20 = vadd.f32 %v3029_v15, %v2982_v35  ;;  %v1884_v29 = vpop.permute.xlu1 %1883 }
 0x44b   : > { %v1939_v17 = vmul.f32 %v3082_v21, %v1683_v63  ;;  %v1685_v25 = vmax.f32 %v1578_v16, 0.0  ;;  %v1602_v21 = vadd.f32 %v3026_v7, %v2982_v35  ;;  %v1944_v32 = vmul.f32 %v3100_v48, %v1688_v27  ;;  %v1317_v49 = vpop.permute.xlu0 %1316 }
 0x44c   : > { %v1985_v59 = vadd.f32 %v1984_v11, %v1938_v52  ;;  %v1940_v28 = vmul.f32 %v3080_v51, %v1684_v0  ;;  %v1943_v11 = vmul.f32 %v3102_v23, %v1687_v55  ;;  %v1692_v56 = vmax.f32 %v1596_v30, 0.0 }
 0x44d   : > { %v2022_v2 = vadd.f32 %v2021_v46, %v1939_v17  ;;  %v1941_v47 = vmul.f32 %v3080_v51, %v1685_v25  ;;  %v1606_v51 = vadd.f32 %v3032_v53, %v2980_v34  ;;  %v1945_v1 = vmul.f32 %v3100_v48, %v1689_v8 }
 0x44e   : > { %v1986_v26 = vadd.f32 %v1985_v59, %v1940_v28  ;;  %v1693_v7 = vmax.f32 %v1598_v38, 0.0  ;;  %v1608_v5 = vadd.f32 %v3035_v42, %v2980_v34  ;;  %v1946_v23 = vmul.f32 %v3119_v58, %v1690_v12  ;;  %v3292_v59 = vld [vmem:[#allocation6_spill] sm:$0xff] }
 0x44f   : > { %v2023_v6 = vadd.f32 %v2022_v2, %v1941_v47  ;;  %v1694_v18 = vmax.f32 %v1602_v21, 0.0  ;;  %v1612_v35 = vadd.f32 %v3046_v13, %v2986_v37  ;;  %v1947_v14 = vmul.f32 %v3119_v58, %v1691_v4  ;;  %v1322_v8 = vpop.permute.xlu0 %1321  ;;  %v1889_v21 = vpop.permute.xlu1 %1888 }
 0x450   : > { %v1987_v46 = vadd.f32 %v1986_v26, %v1942_v33  ;;  %v1695_v63 = vmax.f32 %v1604_v20, 0.0  ;;  %v1614_v53 = vadd.f32 %v3049_v54, %v2986_v37  ;;  %v1948_v16 = vmul.f32 %v3123_v19, %v1692_v56 }
 0x451   : > { %v2024_v3 = vadd.f32 %v2023_v6, %v1943_v11  ;;  %v1696_v31 = vmax.f32 %v1606_v51, 0.0  ;;  %v1616_v34 = vadd.f32 %v3052_v40, %v2984_v36  ;;  %v1949_v52 = vmul.f32 %v3123_v19, %v1693_v7  ;;  %v3296_v7 = vld [vmem:[#allocation10_spill] sm:$0xff] }
 0x452   : > { %v1988_v15 = vadd.f32 %v1987_v46, %v1944_v32  ;;  %v1697_v13 = vmax.f32 %v1608_v5, 0.0  ;;  %v1618_v0 = vadd.f32 %v3055_v44, %v2984_v36  ;;  %v1950_v55 = vmul.f32 %v3129_v43, %v1694_v18  ;;  %v3293_v36 = vld [vmem:[#allocation7_spill] sm:$0xff]  ;;  %v3295_v32 = vld [vmem:[#allocation9_spill] sm:$0xff] }
 0x453   : > { %v2025_v48 = vadd.f32 %v2024_v3, %v1945_v1  ;;  %v1698_v62 = vmax.f32 %v1612_v35, 0.0  ;;  %v1622_v37 = vadd.f32 %v3066_v9, %v2990_v39  ;;  %v1951_v17 = vmul.f32 %v3129_v43, %v1695_v63  ;;  %v3294_v9 = vld [vmem:[#allocation8_spill] sm:$0xff] }
 0x454   : > { %v1989_v42 = vadd.f32 %v1988_v15, %v1946_v23  ;;  %v1699_v25 = vmax.f32 %v1614_v53, 0.0  ;;  %v1624_v40 = vadd.f32 %v3069_v41, %v2990_v39  ;;  %v1952_v19 = vmul.f32 %v3133_v10, %v1696_v31  ;;  %v3297_v15 = vld [vmem:[#allocation11_spill] sm:$0xff] }
 0x455   : > { %v2026_v58 = vadd.f32 %v2025_v48, %v1947_v14  ;;  %v1700_v30 = vmax.f32 %v1616_v34, 0.0  ;;  %v1626_v44 = vadd.f32 %v3293_v36, %v3292_v59  ;;  %v1953_v38 = vmul.f32 %v3133_v10, %v1697_v13 }
 0x456   : > { %v1990_v54 = vadd.f32 %v1989_v42, %v1948_v16  ;;  %v1701_v2 = vmax.f32 %v1618_v0, 0.0  ;;  %v1628_v47 = vadd.f32 %v3294_v9, %v3292_v59  ;;  %v1954_v33 = vmul.f32 %v3141_v24, %v1698_v62 }
 0x457   : > { %v2027_v27 = vadd.f32 %v2026_v58, %v1949_v52  ;;  %v1702_v12 = vmax.f32 %v1622_v37, 0.0  ;;  %v1632_v39 = vadd.f32 %v3086_v57, %v3163_v45  ;;  %v1955_v26 = vmul.f32 %v3141_v24, %v1699_v25  ;;  %v3299_v52 = vld [vmem:[#allocation13_spill] sm:$0xff] }
 0x458   : > { %v1991_v28 = vadd.f32 %v1990_v54, %v1950_v55  ;;  %v1703_v11 = vmax.f32 %v1624_v40, 0.0  ;;  %v1634_v4 = vadd.f32 %v3089_v60, %v3163_v45  ;;  %v1956_v20 = vmul.f32 %v3149_v22, %v1700_v30  ;;  %v1327_v60 = vpop.permute.xlu0 %1326 }
 0x459   : > { %v2028_v43 = vadd.f32 %v2027_v27, %v1951_v17  ;;  %v1704_v6 = vmax.f32 %v1626_v44, 0.0  ;;  %v1636_v56 = vadd.f32 %v3295_v32, %v1317_v49  ;;  %v1957_v46 = vmul.f32 %v3149_v22, %v1701_v2  ;;  %v3298_v22 = vld [vmem:[#allocation12_spill] sm:$0xff] }
 0x45a   : > { %v1992_v41 = vadd.f32 %v1991_v28, %v1952_v19  ;;  %v1705_v1 = vmax.f32 %v1628_v47, 0.0  ;;  %v1638_v57 = vadd.f32 %v3296_v7, %v1317_v49  ;;  %v1958_v3 = vmul.f32 %v3171_v50, %v1702_v12  ;;  %v1894_v49 = vpop.permute.xlu1 %1893 }
 0x45b   : > { %v2029_v10 = vadd.f32 %v2028_v43, %v1953_v38  ;;  %v1706_v24 = vmax.f32 %v1632_v39, 0.0  ;;  %v1642_v23 = vadd.f32 %v3106_v61, %v1322_v8  ;;  %v1959_v45 = vmul.f32 %v3171_v50, %v1703_v11 }
 0x45c   : > { %v1993_v51 = vadd.f32 %v1992_v41, %v1954_v33  ;;  %v1707_v35 = vmax.f32 %v1634_v4, 0.0  ;;  %v1644_v14 = vadd.f32 %v3297_v15, %v1322_v8  ;;  %v1960_v53 = vmul.f32 %v1884_v29, %v1704_v6  ;;  %v1899_v40 = vpop.permute.xlu0 %1898 }
 0x45d   : > { %v2030_v5 = vadd.f32 %v2029_v10, %v1955_v26  ;;  %v1708_v48 = vmax.f32 %v1636_v56, 0.0  ;;  %v1646_v16 = vadd.f32 %v3298_v22, %v1327_v60  ;;  %v1961_v34 = vmul.f32 %v1884_v29, %v1705_v1 }
 0x45e   : > { %v1994_v18 = vadd.f32 %v1993_v51, %v1956_v20  ;;  %v1709_v42 = vmax.f32 %v1638_v57, 0.0  ;;  %v1648_v13 = vadd.f32 %v3299_v52, %v1327_v60  ;;  %v1962_v61 = vmul.f32 %v1889_v21, %v1706_v24  ;;  %v1904_v29 = vpop.permute.xlu1 %1903 }
 0x45f   : > { %v2031_v63 = vadd.f32 %v2030_v5, %v1957_v46  ;;  %v1710_v58 = vmax.f32 %v1642_v23, 0.0  ;;  %v1963_v62 = vmul.f32 %v1889_v21, %v1707_v35  ;;  %v1711_v50 = vmax.f32 %v1644_v14, 0.0 }
 0x460   : > { %v1995_v31 = vadd.f32 %v1994_v18, %v1958_v3  ;;  %v1964_v54 = vmul.f32 %v1894_v49, %v1708_v48  ;;  %v1712_v17 = vmax.f32 %v1646_v16, 0.0  ;;  %v1965_v27 = vmul.f32 %v1894_v49, %v1709_v42  ;;  %v2048_v56 = vpop.permute.xlu0 %2047 }
 0x461   : > { %v2032_v0 = vadd.f32 %v2031_v63, %v1959_v45  ;;  %v1713_v19 = vmax.f32 %v1648_v13, 0.0  ;;  %v1966_v59 = vmul.f32 %v1899_v40, %v1710_v58  ;;  %v1967_v44 = vmul.f32 %v1899_v40, %v1711_v50 }
 0x462   : > { %v1996_v55 = vadd.f32 %v1995_v31, %v1960_v53  ;;  %v1968_v8 = vmul.f32 %v1904_v29, %v1712_v17  ;;  %v2050_v47 = vlaneseq  ;;  %v2379_v4 = vmov 1966171168  }
 0x463   : > { %v2033_v37 = vadd.f32 %v2032_v0, %v1961_v34  ;;  %v1969_v2 = vmul.f32 %v1904_v29, %v1713_v19  ;;  %v2060_v10 = vunpack.c.l.s4 %v2379_v4 }
 0x464   : > { %v1997_v25 = vadd.f32 %v1996_v55, %v1962_v61  ;;  %v2051_v41 = vshrl.u32 %v2050_v47, 7  ;;  %vm2076_vm3 = vcmp.lt.s32.totalorder %v2050_v47, 256 }
 0x465   : > { %v2034_v30 = vadd.f32 %v2033_v37, %v1963_v62  ;;  %v2061_v1 = vunpack.c.0.s8 %v2060_v10 }
 0x466   : > { %v1998_v36 = vadd.f32 %v1997_v25, %v1964_v54  ;;  %v2052_v6 = vsub.s32 0, %v2051_v41 }
 0x467   : > { %v2035_v28 = vadd.f32 %v2034_v30, %v1965_v27  ;;  %v2064_v23 = vsub.s32 %v2061_v1, %v2051_v41 }
 0x468   : > { %v1999_v38 = vadd.f32 %v1998_v36, %v1966_v59  ;;  %v2053_v57 = vrot.slane %v2048_v56, %v2052_v6 }
 0x469   : > { %v2036_v9 = vadd.f32 %v2035_v28, %v1967_v44 }
 0x46a   : > { %v2000_v43 = vadd.f32 %v1999_v38, %v1968_v8 }
 0x46b   : > { %v2037_v33 = vadd.f32 %v2036_v9, %v1969_v2 }
 0x46c   : > { %v2001_v12 = vrot.slane %v2000_v43, 4 }
 0x46d   : > { %v2038_v39 = vrot.slane %v2037_v33, 4 }
 0x46e   : > { %v2002_v21 = vadd.f32 %v2001_v12, %v2000_v43 }
 0x46f   : > { %v2039_v26 = vadd.f32 %v2038_v39, %v2037_v33 }
 0x470   : > { %v2003_v11 = vrot.slane %v2002_v21, 2 }
 0x471   : > { %v2040_v20 = vrot.slane %v2039_v26, 2 }
 0x472   : > { %v2004_v32 = vadd.f32 %v2003_v11, %v2002_v21 }
 0x473   : > { %v2041_v51 = vadd.f32 %v2040_v20, %v2039_v26 }
 0x474   : > { %v2005_v46 = vrot.slane %v2004_v32, 1 }
 0x475   : > { %v2042_v7 = vrot.slane %v2041_v51, 1 }
 0x476   : > { %v2006_v5 = vadd.f32 %v2005_v46, %v2004_v32 }
 0x477   : > { %v2043_v3 = vadd.f32 %v2042_v7, %v2041_v51 }
 0x478   : > { %v2054_v24 = vadd.f32 %v2053_v57, %v2006_v5 }
 0x479   : > { %v2055_v18 = vadd.f32 %v2053_v57, %v2043_v3 }
 0x47b   : > { %v2058_v60 = vcombine.low %v2054_v24, %v2055_v18 }
 0x47d   : > { %v2065_v45 = vrot.slane %v2058_v60, %v2064_v23 }
 0x47f   : > { %v2072_v35 = vrot.slane %v2065_v45, %v2064_v23 }
 0x481   : > { %2078 = vst.msk [vmem:[%s382_s30] sm:$0x3] %vm2076_vm3, %v2072_v35 }
 0x482   : > { %2327 = shalt.err (!%p2324_p3)
}
 0x483   : > { %s2328_s23 = scalar_lea.hbm %s3227_s16, 32  ;;  %s2332_s13 = scalar_lea.hbm %s3280_s11, 64 }
 0x484   : > { %p2329_p4 = scmp.ne.s32.totalorder %s3227_s16, %s2328_s23  ;;  %p2333_p9 = scmp.lt.u32.totalorder %s3227_s16, %s3280_s11 }
 0x485   : > { %p2334_p10 = scmp.lt.u32.totalorder %s2332_s13, %s2328_s23  ;;  %p2336_p12 = scmp.lt.u32.totalorder %s2328_s23, %s3227_s16 }
 0x486   : > { %p2330_p7 = pnand %p2329_p4, %p2482_p5 }
 0x487   : > { %p2335_p11 = por %p2334_p10, %p2333_p9 }
 0x488   : > { %p2331_p8 = pneg %p2330_p7 }
 0x489   : > { %p2337_p13 = por %p2336_p12, %p2335_p11 }
 0x48b   : > { %p2338_p0 = pnand %p2337_p13, %p2331_p8 }
 0x48d   : > { %2341 = shalt.err (!%p2338_p0)
}
 0x48e   : > { %2237 = dma.vmem_to_hbm [thread:$0]  (%p2482_p5), %s3229_s12, 32, %s3227_s16, %s2080_s17  }
 0x48f PF: > { %p2243_p1 = scmp.ge.s32.totalorder %s2376_s22, 2  ;;  %s2106_s15 = sand.u32 1, %s2364_s19  }
 0x490   : > { %s2107_s18 = scalar_lea.sflag [#allocation4], %s2106_s15 }
 0x491   : > { %p2240_p2 = pnand %p2243_p1, %p2486_p6 }
 0x493   : > { %2359 = dma.done.wait (!%p2240_p2), %s2107_s18, 32  }
 0x494   : > { %2361 = vsyncadd (!%p2240_p2), %s2107_s18, 4294967264  ;;  %p23_p3 = scmp.ge.s32.totalorder %s2469_s24, 4   ;;  %s3300_s19 = smov %s2368_s20 }
 0x495   : > { %s3301_s20 = smov %s2372_s21  ;;  %s3302_s21 = smov %s2480_s27 }
 0x496   : > { %s3303_s22 = smov %s2469_s24  ;;  %25 = sbr.rel (!%p23_p3) target bundleno = 6 (0x6), region = 99 }
 0x49d   :  { %2112 = vsyncpa [#allocation4], 1 }
 0x49e   :  { %2114 = vsyncpa [#allocation4 + $0x1], 1 }

</bundles_post_ra>
